<compile_context>
chip_gen: v5e
topology: v5e:2x2
jax: 0.10.0
libtpu: 0.0.40
codegen_flags: <defaults>
</compile_context>

<pallas_src>
import functools

import jax
import jax.numpy as jnp
from jax import lax
from jax.experimental import pallas as pl
from jax.experimental.pallas import tpu as pltpu


# ConvTranspose2d(k=4, s=2, p=1) parity algebra (per spatial axis):
#   out[2m + 0] = x[m-1]*w[3] + x[m]*w[1]   -> padded window start 0, taps (w3, w1)
#   out[2m + 1] = x[m]  *w[2] + x[m+1]*w[0] -> padded window start 1, taps (w2, w0)
# _KIDX[parity][tap_offset] = ConvTranspose kernel index used by that tap.
_KIDX = ((3, 1), (2, 0))


# ----------------------------------------------------------------------------
# Pallas kernel: fused (W @ X) [f32 acc] -> *bn_scale +bn_bias -> activation
# ----------------------------------------------------------------------------
def _fused_matmul_kernel(w_ref, x_ref, s_ref, b_ref, o_ref, *, activation):
    # bf16 x bf16 -> f32 accumulation: native MXU fast path on v5e/v6e/v7x.
    y = jnp.dot(w_ref[...], x_ref[...], preferred_element_type=jnp.float32)
    # Inference-BN affine applied post-accumulation in f32 (matches conv->BN).
    y = y * s_ref[...] + b_ref[...]                 # (Cout, tm) * (Cout, 1) + (Cout, 1)
    if activation == "relu":
        y = jnp.maximum(y, 0.0)
    elif activation == "tanh":
        y = jnp.tanh(y)
    o_ref[...] = y.astype(o_ref.dtype)              # bf16 hidden layers, f32 final


def _pick_m_tile(m, k, cout, o_bytes, budget_bytes=16 * 1024 * 1024):
    """Largest M tile that is the full M or a 128-multiple divisor of M and whose
    double-buffered block footprint stays under a conservative VMEM budget
    (v7x: 64 MiB physical / 32 MiB default scoped; v5e/v6e have more headroom).
    Small layers get a single grid step -> no grid-split overhead on 1-TC chips."""
    def footprint(tm):
        return (2 * k * tm * 2             # X block (bf16), double-buffered
                + 2 * cout * tm * o_bytes  # out block, double-buffered
                + 2 * cout * k * 2         # weight slab (changes per parity)
                + 2 * 2 * cout * 4)        # bn scale + bias (f32)
    if footprint(m) <= budget_bytes:
        return m
    tm = m
    while tm % 2 == 0 and (tm // 2) % 128 == 0 and footprint(tm) > budget_bytes:
        tm //= 2
    return tm


def _parity_matmul(wt, xt, scale, bias, *, activation, out_dtype):
    """One pallas_call for all 4 output parities of a stride-2 deconv layer.

    wt:    (4, Cout, K) bf16  per-parity weight slabs, K = 4*Cin
    xt:    (4, K, M)    bf16  per-parity transposed patch matrices, M = N*H*W
    scale: (Cout, 1)    f32   inference-BN scale (ones for the final layer)
    bias:  (Cout, 1)    f32   inference-BN bias  (zeros for the final layer)
    returns (4, Cout, M) in out_dtype, lane-dense along M.
    """
    p_cnt, cout, k = wt.shape
    m = xt.shape[-1]
    tm = _pick_m_tile(m, k, cout, jnp.dtype(out_dtype).itemsize)
    grid = (p_cnt, m // tm)

    kernel = functools.partial(_fused_matmul_kernel, activation=activation)
    return pl.pallas_call(
        kernel,
        out_shape=jax.ShapeDtypeStruct((p_cnt, cout, m), out_dtype),
        grid_spec=pltpu.PrefetchScalarGridSpec(
            num_scalar_prefetch=0,
            grid=grid,
            in_specs=[
                # weight slab: constant over the (fast) M axis -> VMEM-resident
                pl.BlockSpec((None, cout, k), lambda p, i: (p, 0, 0)),
                # patch matrix block: lane dim is M (lane-dense loads)
                pl.BlockSpec((None, k, tm), lambda p, i: (p, 0, i)),
                pl.BlockSpec((cout, 1), lambda p, i: (0, 0)),
                pl.BlockSpec((cout, 1), lambda p, i: (0, 0)),
            ],
            # lane-dense (Cout, M) output tiles: unmasked stores even for Cout=3
            out_specs=pl.BlockSpec((None, cout, tm), lambda p, i: (p, 0, i)),
        ),
        compiler_params=pltpu.CompilerParams(
            dimension_semantics=("parallel", "parallel")),
    )(wt, xt, scale, bias)


def pallas_deconv_x2(a_cf, wt, scale, bias, *, activation, out_dtype):
    """ConvTranspose2d(4, stride=2, pad=1, bias=False) + inference-BN + activation.

    a_cf: (Cin, N, H, W) channel-first activation (bf16).
    Returns (Cout, N, 2H, 2W) channel-first in out_dtype.
    """
    cin, n, h, w = a_cf.shape
    cout = wt.shape[1]
    ap = jnp.pad(a_cf, ((0, 0), (0, 0), (1, 1), (1, 1)))   # (Cin, N, H+2, W+2)

    # Per-parity transposed patch matrices (only the 2x2 tap window each parity
    # actually needs; no dilated zeros).
    # TODO(synk): still 4x activation bytes in HBM; see module TODO for the
    # in-kernel gather alternative.
    xts = []
    for r in (0, 1):
        for c in (0, 1):
            taps = [ap[:, :, r + dr:r + dr + h, c + dc:c + dc + w]
                    for dr in (0, 1) for dc in (0, 1)]      # 4 x (Cin, N, H, W)
            xts.append(jnp.stack(taps, axis=0).reshape(4 * cin, n * h * w))
    xt = jnp.stack(xts, axis=0)                             # (4, 4*Cin, M), p = 2r+c

    y = _parity_matmul(wt, xt, scale, bias,
                       activation=activation, out_dtype=out_dtype)   # (4, Cout, M)

    # Pixel-shuffle the 4 parities back into the full-resolution output.
    y = y.reshape(2, 2, cout, n, h, w)
    return y.transpose(2, 3, 4, 0, 5, 1).reshape(cout, n, 2 * h, 2 * w)


# ----------------------------------------------------------------------------
# Parameter construction (deterministic) + one-time kernel-ready preparation
# ----------------------------------------------------------------------------
def _fold_bn(gamma, beta, running_mean, running_var, eps=1e-5):
    scale = gamma / jnp.sqrt(running_var + eps)
    bias = beta - running_mean * scale
    return scale, bias


def _parity_weight_slabs(w_icohw):
    """ConvTranspose weight (Cin, Cout, 4, 4) -> (4, Cout, 4*Cin) parity slabs.
    Parity p = 2r + c; K index = tap*Cin + cin with tap = 2*dr + dc (matches the
    patch-matrix row order built in pallas_deconv_x2)."""
    cin, cout, kh, kw = w_icohw.shape
    assert (kh, kw) == (4, 4)
    slabs = []
    for r in (0, 1):
        for c in (0, 1):
            taps = [w_icohw[:, :, _KIDX[r][dr], _KIDX[c][dc]]     # (Cin, Cout)
                    for dr in (0, 1) for dc in (0, 1)]
            slabs.append(jnp.stack(taps, axis=0).reshape(4 * cin, cout).T)
    return jnp.stack(slabs, axis=0)                               # (4, Cout, 4*Cin)


def make_params(key, nc, nz, ngf):
    ks = jax.random.split(key, 10)

    def w(k, shape):
        return jax.random.normal(k, shape, jnp.float32) * 0.05

    p = {}
    # ConvTranspose2d weight layout: (Cin, Cout, KH, KW)
    p["w1"] = w(ks[0], (nz + 1, ngf * 8, 4, 4))
    p["w2"] = w(ks[1], (ngf * 8, ngf * 4, 4, 4))
    p["w3"] = w(ks[2], (ngf * 4, ngf * 2, 4, 4))
    p["w4"] = w(ks[3], (ngf * 2, ngf, 4, 4))
    p["w5"] = w(ks[4], (ngf, nc, 4, 4))
    for idx, c in ((1, ngf * 8), (2, ngf * 4), (3, ngf * 2), (4, ngf)):
        kk = jax.random.split(ks[4 + idx], 4)
        gamma = 1.0 + 0.1 * jax.random.normal(kk[0], (c,), jnp.float32)
        beta = 0.1 * jax.random.normal(kk[1], (c,), jnp.float32)
        rmean = 0.1 * jax.random.normal(kk[2], (c,), jnp.float32)
        rvar = 1.0 + 0.1 * jnp.abs(jax.random.normal(kk[3], (c,), jnp.float32))
        p[f"bn{idx}"] = _fold_bn(gamma, beta, rmean, rvar)
    return p


def prepare_params(p):
    """One-time weight prep hoisted out of the per-forward jit (review item 4):
    parity slabs, bf16 casts, (Cout, 1) BN columns."""
    prep = {"w1": p["w1"].astype(jnp.bfloat16)}                   # (Cin, Cout, 4, 4)
    s1, b1 = p["bn1"]
    prep["s1"] = s1.reshape(-1, 1, 1, 1)
    prep["b1"] = b1.reshape(-1, 1, 1, 1)
    for idx in (2, 3, 4, 5):
        prep[f"wt{idx}"] = _parity_weight_slabs(p[f"w{idx}"]).astype(jnp.bfloat16)
        if idx < 5:
            s, b = p[f"bn{idx}"]
        else:                                   # final layer: Tanh, no BatchNorm
            cout = p["w5"].shape[1]
            s = jnp.ones((cout,), jnp.float32)
            b = jnp.zeros((cout,), jnp.float32)
        prep[f"s{idx}"] = s.reshape(-1, 1).astype(jnp.float32)
        prep[f"b{idx}"] = b.reshape(-1, 1).astype(jnp.float32)
    return prep


# ----------------------------------------------------------------------------
# Forward pass
# ----------------------------------------------------------------------------
def generator_forward(z_nchw, prep):
    n = z_nchw.shape[0]
    z = z_nchw.reshape(n, -1).astype(jnp.bfloat16)                # (N, nz+1)

    # Layer 1: ConvTranspose2d(k=4, s=1, p=0) on a 1x1 input is a pure matmul
    # (M = N*16); below pallas_call fixed cost, so it is left to XLA (per perf
    # review).  Output lands directly in channel-first layout.
    y1 = jnp.einsum("nc,cohw->onhw", z, prep["w1"],
                    preferred_element_type=jnp.float32)           # (8*ngf, N, 4, 4)
    h = jnp.maximum(y1 * prep["s1"] + prep["b1"], 0.0).astype(jnp.bfloat16)

    h = pallas_deconv_x2(h, prep["wt2"], prep["s2"], prep["b2"],
                         activation="relu", out_dtype=jnp.bfloat16)    # 8x8
    h = pallas_deconv_x2(h, prep["wt3"], prep["s3"], prep["b3"],
                         activation="relu", out_dtype=jnp.bfloat16)    # 16x16
    h = pallas_deconv_x2(h, prep["wt4"], prep["s4"], prep["b4"],
                         activation="relu", out_dtype=jnp.bfloat16)    # 32x32
    out = pallas_deconv_x2(h, prep["wt5"], prep["s5"], prep["b5"],
                           activation="tanh", out_dtype=jnp.float32)   # 64x64
    return jnp.transpose(out, (1, 0, 2, 3))                            # -> NCHW


# ----------------------------------------------------------------------------
# Pure-JAX reference (independent lhs_dilation formulation; same bf16 storage)
# ----------------------------------------------------------------------------
def _ref_conv_transpose(x_nhwc, w_icohw, stride, pad):
    cin, cout, kh, kw = w_icohw.shape
    w_hwio = jnp.transpose(w_icohw[:, :, ::-1, ::-1], (2, 3, 0, 1))   # (KH,KW,Cin,Cout)
    return lax.conv_general_dilated(
        x_nhwc, w_hwio, window_strides=(1, 1),
        padding=[(kh - 1 - pad, kh - 1 - pad), (kw - 1 - pad, kw - 1 - pad)],
        lhs_dilation=(stride, stride),
        dimension_numbers=("NHWC", "HWIO", "NHWC"),
        preferred_element_type=jnp.float32,
    )


def reference_forward(z_nchw, p):
    h = jnp.transpose(z_nchw, (0, 2, 3, 1)).astype(jnp.bfloat16)
    for wname, bnname, s, pd in (("w1", "bn1", 1, 0), ("w2", "bn2", 2, 1),
                                 ("w3", "bn3", 2, 1), ("w4", "bn4", 2, 1)):
        sc, bs = p[bnname]
        y = _ref_conv_transpose(h, p[wname].astype(jnp.bfloat16), s, pd)
        h = jnp.maximum(y * sc + bs, 0.0).astype(jnp.bfloat16)
    y = _ref_conv_transpose(h, p["w5"].astype(jnp.bfloat16), 2, 1)
    return jnp.transpose(jnp.tanh(y), (0, 3, 1, 2))


if __name__ == "__main__":
    # Small shapes consistent with the module: z is (N, nz+1, 1, 1); the 5-layer
    # stack fixes the spatial progression 1 -> 4 -> 8 -> 16 -> 32 -> 64.
    NC, NZ, NGF, BATCH = 3, 16, 16, 2

    key = jax.random.PRNGKey(0)
    k_z, k_par = jax.random.split(key)
    z = jax.random.normal(k_z, (BATCH, NZ + 1, 1, 1), jnp.float32)
    raw_params = make_params(k_par, NC, NZ, NGF)
    prep = prepare_params(raw_params)          # one-time, outside the jitted forward

    fwd = jax.jit(generator_forward)
    out = jax.block_until_ready(fwd(z, prep))

    ref = reference_forward(z, raw_params)
    assert out.shape == (BATCH, NC, 64, 64), out.shape
    # bf16 activations/weights with f32 accumulation on both paths.
    assert jnp.allclose(out, ref.astype(jnp.float32), atol=2e-2, rtol=2e-2)

    print("KERNEL_OK")
</pallas_src>

<mosaic_0001>
module attributes {stable_mosaic.version = 11 : i64} {
  func.func @_fused_matmul_kernel(%arg0: i32, %arg1: i32, %arg2: memref<1x64x512xbf16, #tpu.memory_space<vmem>>, %arg3: memref<1x512x32xbf16, #tpu.memory_space<vmem>>, %arg4: memref<64x1xf32, #tpu.memory_space<vmem>>, %arg5: memref<64x1xf32, #tpu.memory_space<vmem>>, %arg6: memref<1x64x32xbf16, #tpu.memory_space<vmem>>) attributes {dimension_semantics = [#tpu.dimension_semantics<parallel>, #tpu.dimension_semantics<parallel>], iteration_bounds = array<i64: 4, 1>, scalar_prefetch = 0 : i64, scratch_operands = 0 : i64, tpu.core_type = #tpu.core_type<tc>, window_params = [{transform_indices = @transform_0, window_bounds = array<i64: 1, 64, 512>}, {transform_indices = @transform_1, window_bounds = array<i64: 1, 512, 32>}, {pipeline_mode = #tpu.pipeline_mode<synchronous>, transform_indices = @transform_2, window_bounds = array<i64: 64, 1>}, {pipeline_mode = #tpu.pipeline_mode<synchronous>, transform_indices = @transform_3, window_bounds = array<i64: 64, 1>}, {transform_indices = @transform_4, window_bounds = array<i64: 1, 64, 32>}]} {
    %c0 = arith.constant 0 : index
    %c0_0 = arith.constant 0 : index
    %c0_1 = arith.constant 0 : index
    %0 = vector.load %arg2[%c0, %c0_0, %c0_1] : memref<1x64x512xbf16, #tpu.memory_space<vmem>>, vector<1x64x512xbf16>
    %1 = vector.shape_cast %0 : vector<1x64x512xbf16> to vector<64x512xbf16>
    %c0_2 = arith.constant 0 : index
    %c0_3 = arith.constant 0 : index
    %c0_4 = arith.constant 0 : index
    %2 = vector.load %arg3[%c0_2, %c0_3, %c0_4] : memref<1x512x32xbf16, #tpu.memory_space<vmem>>, vector<1x512x32xbf16>
    %3 = vector.shape_cast %2 : vector<1x512x32xbf16> to vector<512x32xbf16>
    %cst = arith.constant dense<0.000000e+00> : vector<64x32xf32>
    %4 = tpu.matmul %1, %3, %cst {dimension_numbers = #tpu.dot_dimension_numbers<[1], [0], [0], [1], [0, 0, 1, 1], [], []>} : vector<64x512xbf16>, vector<512x32xbf16>, vector<64x32xf32> -> vector<64x32xf32>
    %c0_5 = arith.constant 0 : index
    %c0_6 = arith.constant 0 : index
    %5 = vector.load %arg4[%c0_5, %c0_6] : memref<64x1xf32, #tpu.memory_space<vmem>>, vector<64x1xf32>
    %6 = vector.broadcast %5 : vector<64x1xf32> to vector<64x32xf32>
    %7 = arith.mulf %4, %6 : vector<64x32xf32>
    %c0_7 = arith.constant 0 : index
    %c0_8 = arith.constant 0 : index
    %8 = vector.load %arg5[%c0_7, %c0_8] : memref<64x1xf32, #tpu.memory_space<vmem>>, vector<64x1xf32>
    %9 = vector.broadcast %8 : vector<64x1xf32> to vector<64x32xf32>
    %10 = arith.addf %7, %9 : vector<64x32xf32>
    %cst_9 = arith.constant 0.000000e+00 : f32
    %11 = vector.broadcast %cst_9 : f32 to vector<64x32xf32>
    %12 = arith.maximumf %10, %11 : vector<64x32xf32>
    %13 = arith.truncf %12 : vector<64x32xf32> to vector<64x32xbf16>
    %c0_10 = arith.constant 0 : index
    %c0_11 = arith.constant 0 : index
    %c0_12 = arith.constant 0 : index
    %14 = vector.load %arg6[%c0_10, %c0_11, %c0_12] : memref<1x64x32xbf16, #tpu.memory_space<vmem>>, vector<1x64x32xbf16>
    %15 = vector.shape_cast %14 : vector<1x64x32xbf16> to vector<64x32xbf16>
    %16 = vector.shape_cast %13 : vector<64x32xbf16> to vector<1x64x32xbf16>
    tpu.vector_store %arg6[%c0_10, %c0_11, %c0_12], %16 {strides = array<i32>} : memref<1x64x32xbf16, #tpu.memory_space<vmem>>, vector<1x64x32xbf16>,
    return
  }
  func.func @transform_0(%arg0: i32, %arg1: i32) -> (i32, i32, i32) {
    %c0_i32 = arith.constant 0 : i32
    %c0_i32_0 = arith.constant 0 : i32
    %c0_i32_1 = arith.constant 0 : i32
    return %arg0, %c0_i32, %c0_i32_0 : i32, i32, i32
  }
  func.func @transform_1(%arg0: i32, %arg1: i32) -> (i32, i32, i32) {
    %c0_i32 = arith.constant 0 : i32
    %c0_i32_0 = arith.constant 0 : i32
    return %arg0, %c0_i32, %arg1 : i32, i32, i32
  }
  func.func @transform_2(%arg0: i32, %arg1: i32) -> (i32, i32) {
    %c0_i32 = arith.constant 0 : i32
    %c0_i32_0 = arith.constant 0 : i32
    %c0_i32_1 = arith.constant 0 : i32
    return %c0_i32, %c0_i32_0 : i32, i32
  }
  func.func @transform_3(%arg0: i32, %arg1: i32) -> (i32, i32) {
    %c0_i32 = arith.constant 0 : i32
    %c0_i32_0 = arith.constant 0 : i32
    %c0_i32_1 = arith.constant 0 : i32
    return %c0_i32, %c0_i32_0 : i32, i32
  }
  func.func @transform_4(%arg0: i32, %arg1: i32) -> (i32, i32, i32) {
    %c0_i32 = arith.constant 0 : i32
    %c0_i32_0 = arith.constant 0 : i32
    return %arg0, %c0_i32, %arg1 : i32, i32, i32
  }
}

module attributes {stable_mosaic.version = 11 : i64} {
  func.func @_fused_matmul_kernel(%arg0: i32, %arg1: i32, %arg2: memref<1x32x256xbf16, #tpu.memory_space<vmem>>, %arg3: memref<1x256x128xbf16, #tpu.memory_space<vmem>>, %arg4: memref<32x1xf32, #tpu.memory_space<vmem>>, %arg5: memref<32x1xf32, #tpu.memory_space<vmem>>, %arg6: memref<1x32x128xbf16, #tpu.memory_space<vmem>>) attributes {dimension_semantics = [#tpu.dimension_semantics<parallel>, #tpu.dimension_semantics<parallel>], iteration_bounds = array<i64: 4, 1>, scalar_prefetch = 0 : i64, scratch_operands = 0 : i64, tpu.core_type = #tpu.core_type<tc>, window_params = [{transform_indices = @transform_0, window_bounds = array<i64: 1, 32, 256>}, {transform_indices = @transform_1, window_bounds = array<i64: 1, 256, 128>}, {pipeline_mode = #tpu.pipeline_mode<synchronous>, transform_indices = @transform_2, window_bounds = array<i64: 32, 1>}, {pipeline_mode = #tpu.pipeline_mode<synchronous>, transform_indices = @transform_3, window_bounds = array<i64: 32, 1>}, {transform_indices = @transform_4, window_bounds = array<i64: 1, 32, 128>}]} {
    %c0 = arith.constant 0 : index
    %c0_0 = arith.constant 0 : index
    %c0_1 = arith.constant 0 : index
    %0 = vector.load %arg2[%c0, %c0_0, %c0_1] : memref<1x32x256xbf16, #tpu.memory_space<vmem>>, vector<1x32x256xbf16>
    %1 = vector.shape_cast %0 : vector<1x32x256xbf16> to vector<32x256xbf16>
    %c0_2 = arith.constant 0 : index
    %c0_3 = arith.constant 0 : index
    %c0_4 = arith.constant 0 : index
    %2 = vector.load %arg3[%c0_2, %c0_3, %c0_4] : memref<1x256x128xbf16, #tpu.memory_space<vmem>>, vector<1x256x128xbf16>
    %3 = vector.shape_cast %2 : vector<1x256x128xbf16> to vector<256x128xbf16>
    %cst = arith.constant dense<0.000000e+00> : vector<32x128xf32>
    %4 = tpu.matmul %1, %3, %cst {dimension_numbers = #tpu.dot_dimension_numbers<[1], [0], [0], [1], [0, 0, 1, 1], [], []>} : vector<32x256xbf16>, vector<256x128xbf16>, vector<32x128xf32> -> vector<32x128xf32>
    %c0_5 = arith.constant 0 : index
    %c0_6 = arith.constant 0 : index
    %5 = vector.load %arg4[%c0_5, %c0_6] : memref<32x1xf32, #tpu.memory_space<vmem>>, vector<32x1xf32>
    %6 = vector.broadcast %5 : vector<32x1xf32> to vector<32x128xf32>
    %7 = arith.mulf %4, %6 : vector<32x128xf32>
    %c0_7 = arith.constant 0 : index
    %c0_8 = arith.constant 0 : index
    %8 = vector.load %arg5[%c0_7, %c0_8] : memref<32x1xf32, #tpu.memory_space<vmem>>, vector<32x1xf32>
    %9 = vector.broadcast %8 : vector<32x1xf32> to vector<32x128xf32>
    %10 = arith.addf %7, %9 : vector<32x128xf32>
    %cst_9 = arith.constant 0.000000e+00 : f32
    %11 = vector.broadcast %cst_9 : f32 to vector<32x128xf32>
    %12 = arith.maximumf %10, %11 : vector<32x128xf32>
    %13 = arith.truncf %12 : vector<32x128xf32> to vector<32x128xbf16>
    %c0_10 = arith.constant 0 : index
    %c0_11 = arith.constant 0 : index
    %c0_12 = arith.constant 0 : index
    %14 = vector.load %arg6[%c0_10, %c0_11, %c0_12] : memref<1x32x128xbf16, #tpu.memory_space<vmem>>, vector<1x32x128xbf16>
    %15 = vector.shape_cast %14 : vector<1x32x128xbf16> to vector<32x128xbf16>
    %16 = vector.shape_cast %13 : vector<32x128xbf16> to vector<1x32x128xbf16>
    tpu.vector_store %arg6[%c0_10, %c0_11, %c0_12], %16 {strides = array<i32>} : memref<1x32x128xbf16, #tpu.memory_space<vmem>>, vector<1x32x128xbf16>,
    return
  }
  func.func @transform_0(%arg0: i32, %arg1: i32) -> (i32, i32, i32) {
    %c0_i32 = arith.constant 0 : i32
    %c0_i32_0 = arith.constant 0 : i32
    %c0_i32_1 = arith.constant 0 : i32
    return %arg0, %c0_i32, %c0_i32_0 : i32, i32, i32
  }
  func.func @transform_1(%arg0: i32, %arg1: i32) -> (i32, i32, i32) {
    %c0_i32 = arith.constant 0 : i32
    %c0_i32_0 = arith.constant 0 : i32
    return %arg0, %c0_i32, %arg1 : i32, i32, i32
  }
  func.func @transform_2(%arg0: i32, %arg1: i32) -> (i32, i32) {
    %c0_i32 = arith.constant 0 : i32
    %c0_i32_0 = arith.constant 0 : i32
    %c0_i32_1 = arith.constant 0 : i32
    return %c0_i32, %c0_i32_0 : i32, i32
  }
  func.func @transform_3(%arg0: i32, %arg1: i32) -> (i32, i32) {
    %c0_i32 = arith.constant 0 : i32
    %c0_i32_0 = arith.constant 0 : i32
    %c0_i32_1 = arith.constant 0 : i32
    return %c0_i32, %c0_i32_0 : i32, i32
  }
  func.func @transform_4(%arg0: i32, %arg1: i32) -> (i32, i32, i32) {
    %c0_i32 = arith.constant 0 : i32
    %c0_i32_0 = arith.constant 0 : i32
    return %arg0, %c0_i32, %arg1 : i32, i32, i32
  }
}

module attributes {stable_mosaic.version = 11 : i64} {
  func.func @_fused_matmul_kernel(%arg0: i32, %arg1: i32, %arg2: memref<1x16x128xbf16, #tpu.memory_space<vmem>>, %arg3: memref<1x128x512xbf16, #tpu.memory_space<vmem>>, %arg4: memref<16x1xf32, #tpu.memory_space<vmem>>, %arg5: memref<16x1xf32, #tpu.memory_space<vmem>>, %arg6: memref<1x16x512xbf16, #tpu.memory_space<vmem>>) attributes {dimension_semantics = [#tpu.dimension_semantics<parallel>, #tpu.dimension_semantics<parallel>], iteration_bounds = array<i64: 4, 1>, scalar_prefetch = 0 : i64, scratch_operands = 0 : i64, tpu.core_type = #tpu.core_type<tc>, window_params = [{transform_indices = @transform_0, window_bounds = array<i64: 1, 16, 128>}, {transform_indices = @transform_1, window_bounds = array<i64: 1, 128, 512>}, {pipeline_mode = #tpu.pipeline_mode<synchronous>, transform_indices = @transform_2, window_bounds = array<i64: 16, 1>}, {pipeline_mode = #tpu.pipeline_mode<synchronous>, transform_indices = @transform_3, window_bounds = array<i64: 16, 1>}, {transform_indices = @transform_4, window_bounds = array<i64: 1, 16, 512>}]} {
    %c0 = arith.constant 0 : index
    %c0_0 = arith.constant 0 : index
    %c0_1 = arith.constant 0 : index
    %0 = vector.load %arg2[%c0, %c0_0, %c0_1] : memref<1x16x128xbf16, #tpu.memory_space<vmem>>, vector<1x16x128xbf16>
    %1 = vector.shape_cast %0 : vector<1x16x128xbf16> to vector<16x128xbf16>
    %c0_2 = arith.constant 0 : index
    %c0_3 = arith.constant 0 : index
    %c0_4 = arith.constant 0 : index
    %2 = vector.load %arg3[%c0_2, %c0_3, %c0_4] : memref<1x128x512xbf16, #tpu.memory_space<vmem>>, vector<1x128x512xbf16>
    %3 = vector.shape_cast %2 : vector<1x128x512xbf16> to vector<128x512xbf16>
    %cst = arith.constant dense<0.000000e+00> : vector<16x512xf32>
    %4 = tpu.matmul %1, %3, %cst {dimension_numbers = #tpu.dot_dimension_numbers<[1], [0], [0], [1], [0, 0, 1, 1], [], []>} : vector<16x128xbf16>, vector<128x512xbf16>, vector<16x512xf32> -> vector<16x512xf32>
    %c0_5 = arith.constant 0 : index
    %c0_6 = arith.constant 0 : index
    %5 = vector.load %arg4[%c0_5, %c0_6] : memref<16x1xf32, #tpu.memory_space<vmem>>, vector<16x1xf32>
    %6 = vector.broadcast %5 : vector<16x1xf32> to vector<16x512xf32>
    %7 = arith.mulf %4, %6 : vector<16x512xf32>
    %c0_7 = arith.constant 0 : index
    %c0_8 = arith.constant 0 : index
    %8 = vector.load %arg5[%c0_7, %c0_8] : memref<16x1xf32, #tpu.memory_space<vmem>>, vector<16x1xf32>
    %9 = vector.broadcast %8 : vector<16x1xf32> to vector<16x512xf32>
    %10 = arith.addf %7, %9 : vector<16x512xf32>
    %cst_9 = arith.constant 0.000000e+00 : f32
    %11 = vector.broadcast %cst_9 : f32 to vector<16x512xf32>
    %12 = arith.maximumf %10, %11 : vector<16x512xf32>
    %13 = arith.truncf %12 : vector<16x512xf32> to vector<16x512xbf16>
    %c0_10 = arith.constant 0 : index
    %c0_11 = arith.constant 0 : index
    %c0_12 = arith.constant 0 : index
    %14 = vector.load %arg6[%c0_10, %c0_11, %c0_12] : memref<1x16x512xbf16, #tpu.memory_space<vmem>>, vector<1x16x512xbf16>
    %15 = vector.shape_cast %14 : vector<1x16x512xbf16> to vector<16x512xbf16>
    %16 = vector.shape_cast %13 : vector<16x512xbf16> to vector<1x16x512xbf16>
    tpu.vector_store %arg6[%c0_10, %c0_11, %c0_12], %16 {strides = array<i32>} : memref<1x16x512xbf16, #tpu.memory_space<vmem>>, vector<1x16x512xbf16>,
    return
  }
  func.func @transform_0(%arg0: i32, %arg1: i32) -> (i32, i32, i32) {
    %c0_i32 = arith.constant 0 : i32
    %c0_i32_0 = arith.constant 0 : i32
    %c0_i32_1 = arith.constant 0 : i32
    return %arg0, %c0_i32, %c0_i32_0 : i32, i32, i32
  }
  func.func @transform_1(%arg0: i32, %arg1: i32) -> (i32, i32, i32) {
    %c0_i32 = arith.constant 0 : i32
    %c0_i32_0 = arith.constant 0 : i32
    return %arg0, %c0_i32, %arg1 : i32, i32, i32
  }
  func.func @transform_2(%arg0: i32, %arg1: i32) -> (i32, i32) {
    %c0_i32 = arith.constant 0 : i32
    %c0_i32_0 = arith.constant 0 : i32
    %c0_i32_1 = arith.constant 0 : i32
    return %c0_i32, %c0_i32_0 : i32, i32
  }
  func.func @transform_3(%arg0: i32, %arg1: i32) -> (i32, i32) {
    %c0_i32 = arith.constant 0 : i32
    %c0_i32_0 = arith.constant 0 : i32
    %c0_i32_1 = arith.constant 0 : i32
    return %c0_i32, %c0_i32_0 : i32, i32
  }
  func.func @transform_4(%arg0: i32, %arg1: i32) -> (i32, i32, i32) {
    %c0_i32 = arith.constant 0 : i32
    %c0_i32_0 = arith.constant 0 : i32
    return %arg0, %c0_i32, %arg1 : i32, i32, i32
  }
}

module attributes {stable_mosaic.version = 11 : i64} {
  func.func @_fused_matmul_kernel(%arg0: i32, %arg1: i32, %arg2: memref<1x3x64xbf16, #tpu.memory_space<vmem>>, %arg3: memref<1x64x2048xbf16, #tpu.memory_space<vmem>>, %arg4: memref<3x1xf32, #tpu.memory_space<vmem>>, %arg5: memref<3x1xf32, #tpu.memory_space<vmem>>, %arg6: memref<1x3x2048xf32, #tpu.memory_space<vmem>>) attributes {dimension_semantics = [#tpu.dimension_semantics<parallel>, #tpu.dimension_semantics<parallel>], iteration_bounds = array<i64: 4, 1>, scalar_prefetch = 0 : i64, scratch_operands = 0 : i64, tpu.core_type = #tpu.core_type<tc>, window_params = [{transform_indices = @transform_0, window_bounds = array<i64: 1, 3, 64>}, {transform_indices = @transform_1, window_bounds = array<i64: 1, 64, 2048>}, {pipeline_mode = #tpu.pipeline_mode<synchronous>, transform_indices = @transform_2, window_bounds = array<i64: 3, 1>}, {pipeline_mode = #tpu.pipeline_mode<synchronous>, transform_indices = @transform_3, window_bounds = array<i64: 3, 1>}, {transform_indices = @transform_4, window_bounds = array<i64: 1, 3, 2048>}]} {
    %c0 = arith.constant 0 : index
    %c0_0 = arith.constant 0 : index
    %c0_1 = arith.constant 0 : index
    %0 = vector.load %arg2[%c0, %c0_0, %c0_1] : memref<1x3x64xbf16, #tpu.memory_space<vmem>>, vector<1x3x64xbf16>
    %1 = vector.shape_cast %0 : vector<1x3x64xbf16> to vector<3x64xbf16>
    %c0_2 = arith.constant 0 : index
    %c0_3 = arith.constant 0 : index
    %c0_4 = arith.constant 0 : index
    %2 = vector.load %arg3[%c0_2, %c0_3, %c0_4] : memref<1x64x2048xbf16, #tpu.memory_space<vmem>>, vector<1x64x2048xbf16>
    %3 = vector.shape_cast %2 : vector<1x64x2048xbf16> to vector<64x2048xbf16>
    %cst = arith.constant dense<0.000000e+00> : vector<3x2048xf32>
    %4 = tpu.matmul %1, %3, %cst {dimension_numbers = #tpu.dot_dimension_numbers<[1], [0], [0], [1], [0, 0, 1, 1], [], []>} : vector<3x64xbf16>, vector<64x2048xbf16>, vector<3x2048xf32> -> vector<3x2048xf32>
    %c0_5 = arith.constant 0 : index
    %c0_6 = arith.constant 0 : index
    %5 = vector.load %arg4[%c0_5, %c0_6] : memref<3x1xf32, #tpu.memory_space<vmem>>, vector<3x1xf32>
    %6 = vector.broadcast %5 : vector<3x1xf32> to vector<3x2048xf32>
    %7 = arith.mulf %4, %6 : vector<3x2048xf32>
    %c0_7 = arith.constant 0 : index
    %c0_8 = arith.constant 0 : index
    %8 = vector.load %arg5[%c0_7, %c0_8] : memref<3x1xf32, #tpu.memory_space<vmem>>, vector<3x1xf32>
    %9 = vector.broadcast %8 : vector<3x1xf32> to vector<3x2048xf32>
    %10 = arith.addf %7, %9 : vector<3x2048xf32>
    %11 = math.tanh %10 : vector<3x2048xf32>
    %c0_9 = arith.constant 0 : index
    %c0_10 = arith.constant 0 : index
    %c0_11 = arith.constant 0 : index
    %12 = vector.load %arg6[%c0_9, %c0_10, %c0_11] : memref<1x3x2048xf32, #tpu.memory_space<vmem>>, vector<1x3x2048xf32>
    %13 = vector.shape_cast %12 : vector<1x3x2048xf32> to vector<3x2048xf32>
    %14 = vector.shape_cast %11 : vector<3x2048xf32> to vector<1x3x2048xf32>
    tpu.vector_store %arg6[%c0_9, %c0_10, %c0_11], %14 {strides = array<i32>} : memref<1x3x2048xf32, #tpu.memory_space<vmem>>, vector<1x3x2048xf32>,
    return
  }
  func.func @transform_0(%arg0: i32, %arg1: i32) -> (i32, i32, i32) {
    %c0_i32 = arith.constant 0 : i32
    %c0_i32_0 = arith.constant 0 : i32
    %c0_i32_1 = arith.constant 0 : i32
    return %arg0, %c0_i32, %c0_i32_0 : i32, i32, i32
  }
  func.func @transform_1(%arg0: i32, %arg1: i32) -> (i32, i32, i32) {
    %c0_i32 = arith.constant 0 : i32
    %c0_i32_0 = arith.constant 0 : i32
    return %arg0, %c0_i32, %arg1 : i32, i32, i32
  }
  func.func @transform_2(%arg0: i32, %arg1: i32) -> (i32, i32) {
    %c0_i32 = arith.constant 0 : i32
    %c0_i32_0 = arith.constant 0 : i32
    %c0_i32_1 = arith.constant 0 : i32
    return %c0_i32, %c0_i32_0 : i32, i32
  }
  func.func @transform_3(%arg0: i32, %arg1: i32) -> (i32, i32) {
    %c0_i32 = arith.constant 0 : i32
    %c0_i32_0 = arith.constant 0 : i32
    %c0_i32_1 = arith.constant 0 : i32
    return %c0_i32, %c0_i32_0 : i32, i32
  }
  func.func @transform_4(%arg0: i32, %arg1: i32) -> (i32, i32, i32) {
    %c0_i32 = arith.constant 0 : i32
    %c0_i32_0 = arith.constant 0 : i32
    return %arg0, %c0_i32, %arg1 : i32, i32, i32
  }
}

</mosaic_0001>

<bundles_post_ra>
// kernel: generator_forward.4
= control target key start
LH: loop header
LB: loop body
LE: loop exit
PB: predicated region body
PF: predicated region fallthrough
CT: control target
= control target key end

     0   :  { %9 = vsyncpa [#allocation3], 0  ;;  %s1653_s0 = inlined_call_operand.hbm [shape: bf16[4,64,512], index: 0, kind: input, shape index: {}]   ;;  %s1654_s1 = inlined_call_operand.vmem [shape: bf16[4,512,32], index: 1, kind: input, shape index: {}]   ;;  %s1655_s2 = inlined_call_operand.vmem [shape: f32[64,1], index: 2, kind: input, shape index: {}]   ;;  %s1656_s3 = inlined_call_operand.vmem [shape: f32[64,1], index: 3, kind: input, shape index: {}]   ;;  %s1657_s4 = inlined_call_operand.vmem [shape: bf16[4,64,32], index: 4, kind: output, shape index: {}]  }
   0x1   :  { %11 = vsyncpa [#allocation3 + $0x1], 0  ;;  %s1412_s15 = smov 0   ;;  %s1414_s16 = smov 0  }
   0x2   :  { %s1416_s17 = smov 0   ;;  %s1418_s18 = smov 0  }
   0x3   :  { %s1420_s19 = smov 0   ;;  %s1422_s20 = smov 0  }
   0x4 LB: > { %s983_s21 = sadd.s32 4294967295, %s1382_s20   ;;  %s29_s22 = sadd.s32 1, %s1378_s19  ;;  %s1382_s20 = sphi %s1422_s20, %s17_s20   ;;  %s1378_s19 = sphi %s1420_s19, %s1664_s19   ;;  %s1374_s18 = sphi %s1418_s18, %s1663_s18   ;;  %s1370_s17 = sphi %s1416_s17, %s1662_s17   ;;  %s1366_s16 = sphi %s1414_s16, %s1661_s16   ;;  %s1362_s15 = sphi %s1412_s15, %s1660_s15  }
   0x5   : > { %p31_p0 = scmp.ge.s32.totalorder %s29_s22, 4  ;;  %s36_s23 = sadd.s32 1, %s1370_s17 }
   0x6   : > { %p43_p1 = scmp.ne.s32.totalorder %s1370_s17, %s1366_s16  ;;  %p44_p2 = scmp.eq.s32.totalorder %s1382_s20, 0 }
   0x7   : > { %s1666_s22 = smov (%p31_p0, %s29_s22), 0  ;;  %p49_p4 = scmp.ne.s32.totalorder %s1366_s16, %s1362_s15 }
   0x8   : > { %p1448_p3 = por %p44_p2, %p43_p1  ;;  %s33_s25 = ssub.s32 %s1378_s19, %s1666_s22 }
   0x9   : > { %p50_p5 = scmp.eq.s32.totalorder %s983_s21, 0  ;;  %p34_p6 = scmp.eq.s32.totalorder %s33_s25, 0 }
   0xa   : > { %p1247_p8 = scmp.lt.s32.totalorder %s1382_s20, 4  ;;  %s177_s28 = sand.u32 1, %s1370_s17  }
   0xb   : > { %p1455_p7 = por %p50_p5, %p49_p4  ;;  %s1190_s29 = sshll.u32 %s1378_s19, 7 }
   0xc   : > { %s1461_s27 = scalar_select %p34_p6, %s1370_s17, %s36_s23  }
   0xd   : > { %s987_s30 = sshll.u32 %s177_s28, 7  ;;  %s186_s7 = scalar_lea.hbm %s1653_s0, %s1190_s29 }
   0xe   : > { %s187_s8 = sshll.u32 %s186_s7, 4  ;;  %s181_s9 = scalar_lea.vmem [#allocation2], %s987_s30  ;;  %s188_s8 = int_to_ptr.hbm [resolvable:$true] %s187_s8 }
   0xf   : > { %s189_s10 = sshll.u32 %s181_s9, 4  ;;  %p1244_p9 = pnand %p1247_p8, %p1448_p3  ;;  %s190_s10 = int_to_ptr.vmem [resolvable:$true] %s189_s10 }
  0x10   : > { %p990_p10 = scmp.ge.s32.totalorder %s1382_s20, 1  ;;  %p208_p11 = scmp.lt.s32.totalorder %s1382_s20, 5 }
  0x11   : > { %s178_s11 = scalar_lea.sflag [#allocation3], %s177_s28  ;;  %s1384_s12 = smov 256  }
  0x12   : > { %s1385_s13 = smov 16   ;;  %p209_p12 = pnand %p990_p10, %p208_p11 }
  0x13   : > { %1246 = dma.hbm_to_vmem [thread:$0]  (!%p1244_p9), %s188_s8, 2048, %s190_s10, %s178_s11, %s1384_s12, %s1384_s12, %s1385_s13  }
  0x14   : > { %212 = sbr.rel (%p209_p12) target bundleno = 266 (0x10a), region = 36  ;;  %s214_s14 = sand.u32 (!%p209_p12), 1, %s1366_s16  }
  0x15   : > { %s991_s15 = sshll.u32 (!%p209_p12), %s214_s14, 7  ;;  %s215_s21 = scalar_lea.sflag (!%p209_p12), [#allocation3], %s214_s14 }
  0x16   : > { %s1473_s23 = scalar_lea.vmem (!%p209_p12), [#allocation2], %s991_s15 }
  0x19   : > { %1357 = dma.done.wait (%p1455_p7), %s215_s21, 2048  }
  0x1a   : > { %1359 = vsyncadd (%p1455_p7), %s215_s21, 4294965248  ;;  %p255_p13 = scmp.lt.s32.totalorder %s1374_s18, 3  ;;  %v1386_v3 = vmov 0   ;;  %v739_v15 = vld [vmem:[%s1655_s2] sm:$0xff]  ;;  %v741_v20 = vld [vmem:[%s1655_s2 + $0x10] sm:$0xff]  ;;  %vm867_vm0 = vcmask 257024  }
  0x1b   : > { %1299 = vset.pattern.permute.xlu0 %v1386_v3  ;;  %1300 = vset.pattern.permute.xlu1 %v1386_v3  ;;  %v740_v23 = vld [vmem:[%s1655_s2 + $0x8] sm:$0xff]  ;;  %v743_v26 = vld [vmem:[%s1655_s2 + $0x20] sm:$0xff]  ;;  %v742_v29 = vld [vmem:[%s1655_s2 + $0x18] sm:$0xff] }
  0x1c   : > { %s1668_s18 = smov (!%p255_p13, %s1374_s18), 3  ;;  %1301 = vset.pattern.permute.xlu2 %v1386_v3  ;;  %749 = vperm.xlu0 %1299, %v739_v15   ;;  %v998_v38 = vld [vmem:[%s1473_s23] sm:$0xf]  ;;  %v1195_v39 = vld [vmem:[%s1473_s23 + $0xc] sm:$0xf0]  ;;  %v746_v49 = vld [vmem:[%s1655_s2 + $0x38] sm:$0xff] }
  0x1d   : > { %s1191_s24 = sshll.u32 %s1668_s18, 8  ;;  %759 = vperm.xlu1 %1300, %v741_v20   ;;  %769 = vperm.xlu2 %1301, %v743_v26   ;;  %v745_v40 = vld [vmem:[%s1655_s2 + $0x30] sm:$0xff]  ;;  %v1193_v41 = vld [vmem:[%s1473_s23 + $0x4] sm:$0xf]  ;;  %v1006_v43 = vld [vmem:[%s1473_s23 + $0x8] sm:$0xf]  ;;  %v999_v47 = vor.u32 %v1195_v39, %v998_v38 }
  0x1e   : > { %s1487_s29 = scalar_lea.vmem %s1654_s1, %s1191_s24  ;;  %v1000_v42 = vld [vmem:[%s1473_s23 + $0x10] sm:$0xf0]  ;;  %v1196_v44 = vld [vmem:[%s1473_s23 + $0x14] sm:$0xf0]  ;;  %v1194_v45 = vld [vmem:[%s1473_s23 + $0xc] sm:$0xf] }
  0x1f   : > { %v1216_v0 = vld [vmem:[%s1487_s29 + $0x38] sm:$0xff]  ;;  %v1215_v5 = vld [vmem:[%s1487_s29 + $0x30] sm:$0xff]  ;;  %v1214_v9 = vld [vmem:[%s1487_s29 + $0x28] sm:$0xff]  ;;  %v1003_v48 = vor.u32 %v1193_v41, %v1000_v42  ;;  %v1007_v50 = vor.u32 %v1196_v44, %v1006_v43 }
  0x20   : > { %v1224_v1 = vld [vmem:[%s1487_s29 + $0x78] sm:$0xff]  ;;  %623 = vmatpush.bf16.msra.mxu0 %v1216_v0  ;;  %v1223_v6 = vld [vmem:[%s1487_s29 + $0x70] sm:$0xff]  ;;  %v1222_v10 = vld [vmem:[%s1487_s29 + $0x68] sm:$0xff] }
  0x21   : > { %v1232_v2 = vld [vmem:[%s1487_s29 + $0xb8] sm:$0xff]  ;;  %652 = vmatpush.bf16.msra.mxu1 %v1224_v1  ;;  %v1231_v7 = vld [vmem:[%s1487_s29 + $0xb0] sm:$0xff]  ;;  %v1230_v11 = vld [vmem:[%s1487_s29 + $0xa8] sm:$0xff] }
  0x22   : > { %v1240_v4 = vld [vmem:[%s1487_s29 + $0xf8] sm:$0xff]  ;;  %681 = vmatpush.bf16.msra.mxu2 %v1232_v2  ;;  %v1239_v8 = vld [vmem:[%s1487_s29 + $0xf0] sm:$0xff]  ;;  %v1238_v12 = vld [vmem:[%s1487_s29 + $0xe8] sm:$0xff] }
  0x23   : > { %710 = vmatpush.bf16.msra.mxu3 %v1240_v4  ;;  %v1213_v13 = vld [vmem:[%s1487_s29 + $0x20] sm:$0xff]  ;;  %v1212_v18 = vld [vmem:[%s1487_s29 + $0x18] sm:$0xff]  ;;  %v1211_v24 = vld [vmem:[%s1487_s29 + $0x10] sm:$0xff] }
  0x24   : > { %624 = vmatpush.bf16.msra.mxu0 %v1215_v5  ;;  %v1221_v14 = vld [vmem:[%s1487_s29 + $0x60] sm:$0xff]  ;;  %v1220_v19 = vld [vmem:[%s1487_s29 + $0x58] sm:$0xff]  ;;  %v1219_v25 = vld [vmem:[%s1487_s29 + $0x50] sm:$0xff]  ;;  %754 = vperm.xlu0 %1299, %v740_v23  }
  0x25   : > { %653 = vmatpush.bf16.msra.mxu1 %v1223_v6  ;;  %v1229_v16 = vld [vmem:[%s1487_s29 + $0xa0] sm:$0xff]  ;;  %v1228_v21 = vld [vmem:[%s1487_s29 + $0x98] sm:$0xff]  ;;  %v1227_v27 = vld [vmem:[%s1487_s29 + $0x90] sm:$0xff]  ;;  %764 = vperm.xlu1 %1300, %v742_v29  }
  0x26   : > { %682 = vmatpush.bf16.msra.mxu2 %v1231_v7  ;;  %v1237_v17 = vld [vmem:[%s1487_s29 + $0xe0] sm:$0xff]  ;;  %v1236_v22 = vld [vmem:[%s1487_s29 + $0xd8] sm:$0xff]  ;;  %v1235_v28 = vld [vmem:[%s1487_s29 + $0xd0] sm:$0xff] }
  0x27   : > { %711 = vmatpush.bf16.msra.mxu3 %v1239_v8  ;;  %v1210_v30 = vld [vmem:[%s1487_s29 + $0x8] sm:$0xff]  ;;  %v1209_v34 = vld [vmem:[%s1487_s29] sm:$0xff]  ;;  %v1008_v46 = vld [vmem:[%s1473_s23 + $0x18] sm:$0xf0] }
  0x28   : > { %625 = vmatpush.bf16.msra.mxu0 %v1214_v9  ;;  %v1218_v31 = vld [vmem:[%s1487_s29 + $0x48] sm:$0xff]  ;;  %v1217_v35 = vld [vmem:[%s1487_s29 + $0x40] sm:$0xff]  ;;  %v1011_v51 = vor.u32 %v1194_v45, %v1008_v46  ;;  %v797_v54 = vld [vmem:[%s1656_s3 + $0x10] sm:$0xff] }
  0x29   : > { %654 = vmatpush.bf16.msra.mxu1 %v1222_v10  ;;  %v1226_v32 = vld [vmem:[%s1487_s29 + $0x88] sm:$0xff]  ;;  %v1225_v36 = vld [vmem:[%s1487_s29 + $0x80] sm:$0xff]  ;;  %v1199_v57 = vld [vmem:[%s1473_s23 + $0x2c] sm:$0xf0] }
  0x2a   : > { %683 = vmatpush.bf16.msra.mxu2 %v1230_v11  ;;  %v1234_v33 = vld [vmem:[%s1487_s29 + $0xc8] sm:$0xff]  ;;  %v1233_v37 = vld [vmem:[%s1487_s29 + $0xc0] sm:$0xff]  ;;  %v1016_v60 = vld [vmem:[%s1473_s23 + $0x30] sm:$0xf0] }
  0x2b   : > { %712 = vmatpush.bf16.msra.mxu3 %v1238_v12  ;;  %v796_v52 = vld [vmem:[%s1656_s3 + $0x8] sm:$0xff]  ;;  %v795_v55 = vld [vmem:[%s1656_s3] sm:$0xff]  ;;  %v1200_v62 = vld [vmem:[%s1473_s23 + $0x34] sm:$0xf0] }
  0x2c   : > { %626 = vmatpush.bf16.msra.mxu0 %v1213_v13  ;;  %779 = vperm.xlu0 %1299, %v745_v40   ;;  %v744_v53 = vld [vmem:[%s1655_s2 + $0x28] sm:$0xff]  ;;  %v1014_v56 = vld [vmem:[%s1473_s23 + $0x20] sm:$0xf]  ;;  %v1197_v59 = vld [vmem:[%s1473_s23 + $0x24] sm:$0xf] }
  0x2d   : > { %655 = vmatpush.bf16.msra.mxu1 %v1221_v14  ;;  %784 = vperm.xlu1 %1300, %v746_v49   ;;  %v799_v58 = vld [vmem:[%s1656_s3 + $0x20] sm:$0xff]  ;;  %v1022_v61 = vld [vmem:[%s1473_s23 + $0x28] sm:$0xf]  ;;  %v1198_v63 = vld [vmem:[%s1473_s23 + $0x2c] sm:$0xf]  ;;  %v1015_v1 = vor.u32 %v1199_v57, %v1014_v56  ;;  %v1019_v2 = vor.u32 %v1197_v59, %v1016_v60 }
  0x2e   : > { %684 = vmatpush.bf16.msra.mxu2 %v1229_v16  ;;  %774 = vperm.xlu2 %1301, %v744_v53   ;;  %v1024_v0 = vld [vmem:[%s1473_s23 + $0x38] sm:$0xf0]  ;;  %v800_v3 = vld [vmem:[%s1656_s3 + $0x28] sm:$0xff]  ;;  %v1023_v4 = vor.u32 %v1200_v62, %v1022_v61  ;;  %v801_v8 = vld [vmem:[%s1656_s3 + $0x30] sm:$0xff] }
  0x2f   : > { %713 = vmatpush.bf16.msra.mxu3 %v1237_v17  ;;  %v1027_v5 = vor.u32 %v1198_v63, %v1024_v0  ;;  %v802_v6 = vld [vmem:[%s1656_s3 + $0x38] sm:$0xff]  ;;  %v1030_v9 = vld [vmem:[%s1473_s23 + $0x40] sm:$0xf]  ;;  %v1203_v10 = vld [vmem:[%s1473_s23 + $0x4c] sm:$0xf0] }
  0x30   : > { %627 = vmatpush.bf16.msra.mxu0 %v1212_v18  ;;  %v798_v7 = vld [vmem:[%s1656_s3 + $0x18] sm:$0xff]  ;;  %v1201_v11 = vld [vmem:[%s1473_s23 + $0x44] sm:$0xf]  ;;  %v1032_v12 = vld [vmem:[%s1473_s23 + $0x50] sm:$0xf0]  ;;  %v1031_v17 = vor.u32 %v1203_v10, %v1030_v9 }
  0x31   : > { %656 = vmatpush.bf16.msra.mxu1 %v1220_v19  ;;  %v1038_v13 = vld [vmem:[%s1473_s23 + $0x48] sm:$0xf]  ;;  %v1204_v14 = vld [vmem:[%s1473_s23 + $0x54] sm:$0xf0]  ;;  %v1202_v15 = vld [vmem:[%s1473_s23 + $0x4c] sm:$0xf]  ;;  %v1035_v18 = vor.u32 %v1201_v11, %v1032_v12 }
  0x32   : > { %685 = vmatpush.bf16.msra.mxu2 %v1228_v21  ;;  %v1040_v16 = vld [vmem:[%s1473_s23 + $0x58] sm:$0xf0]  ;;  %v1039_v19 = vor.u32 %v1204_v14, %v1038_v13  ;;  %v1046_v21 = vld [vmem:[%s1473_s23 + $0x60] sm:$0xf]  ;;  %v1205_v23 = vld [vmem:[%s1473_s23 + $0x64] sm:$0xf] }
  0x33   : > { %714 = vmatpush.bf16.msra.mxu3 %v1236_v22  ;;  %v1043_v20 = vor.u32 %v1202_v15, %v1040_v16  ;;  %v1207_v22 = vld [vmem:[%s1473_s23 + $0x6c] sm:$0xf0]  ;;  %v1208_v26 = vld [vmem:[%s1473_s23 + $0x74] sm:$0xf0] }
  0x34   : > { %628 = vmatpush.bf16.msra.mxu0 %v1211_v24  ;;  %810 = vperm.xlu0 %1299, %v796_v52   ;;  %v1048_v24 = vld [vmem:[%s1473_s23 + $0x70] sm:$0xf0]  ;;  %v1047_v29 = vor.u32 %v1207_v22, %v1046_v21 }
  0x35   : > { %657 = vmatpush.bf16.msra.mxu1 %v1219_v25  ;;  %815 = vperm.xlu1 %1300, %v797_v54   ;;  %v1054_v25 = vld [vmem:[%s1473_s23 + $0x68] sm:$0xf] }
  0x36   : > { %686 = vmatpush.bf16.msra.mxu2 %v1227_v27  ;;  %805 = vperm.xlu2 %1301, %v795_v55   ;;  %v1206_v27 = vld [vmem:[%s1473_s23 + $0x6c] sm:$0xf] }
  0x37   : > { %715 = vmatpush.bf16.msra.mxu3 %v1235_v28  ;;  %v1056_v28 = vld [vmem:[%s1473_s23 + $0x78] sm:$0xf0]  ;;  %s1192_s23 = sshll.u32 %s1668_s18, 5 }
  0x38   : > { %629 = vmatpush.bf16.msra.mxu0 %v1210_v30  ;;  %v1051_v30 = vor.u32 %v1205_v23, %v1048_v24  ;;  %s1611_s28 = scalar_lea.vmem %s1657_s4, %s1192_s23 }
  0x39   : > { %658 = vmatpush.bf16.msra.mxu1 %v1218_v31  ;;  %v1055_v31 = vor.u32 %v1208_v26, %v1054_v25 }
  0x3a   : > { %687 = vmatpush.bf16.msra.mxu2 %v1226_v32  ;;  %v1059_v32 = vor.u32 %v1206_v27, %v1056_v28 }
  0x3b   : > { %716 = vmatpush.bf16.msra.mxu3 %v1234_v33 }
  0x3c   : > { %630 = vmatpush.bf16.msra.mxu0 %v1209_v34  ;;  %825 = vperm.xlu0 %1299, %v799_v58  }
  0x3d   : > { %659 = vmatpush.bf16.msra.mxu1 %v1217_v35  ;;  %830 = vperm.xlu1 %1300, %v800_v3  }
  0x3e   : > { %688 = vmatpush.bf16.msra.mxu2 %v1225_v36  ;;  %820 = vperm.xlu2 %1301, %v798_v7  }
  0x3f   : > { %717 = vmatpush.bf16.msra.mxu3 %v1233_v37  ;;  %631 = vmatmul.bf16.vlgmr.msra.gmra.mxu0 %v999_v47 }
  0x40   : > { %660 = vmatmul.bf16.vlgmr.msra.gmra.mxu1 %v1003_v48 }
  0x41   : > { %689 = vmatmul.bf16.vlgmr.msra.gmra.mxu2 %v1007_v50 }
  0x42   : > { %718 = vmatmul.bf16.vlgmr.msra.gmra.mxu3 %v1011_v51 }
  0x44   : > { %840 = vperm.xlu0 %1299, %v802_v6  }
  0x46   : > { %835 = vperm.xlu2 %1301, %v801_v8  }
  0x4f   : > { %636 = vmatmul.bf16.gmra.mxu0 %v1015_v1 }
  0x50   : > { %665 = vmatmul.bf16.gmra.mxu1 %v1019_v2 }
  0x51   : > { %694 = vmatmul.bf16.gmra.mxu2 %v1023_v4 }
  0x52   : > { %723 = vmatmul.bf16.gmra.mxu3 %v1027_v5 }
  0x5f   : > { %641 = vmatmul.bf16.gmra.mxu0 %v1031_v17 }
  0x60   : > { %670 = vmatmul.bf16.gmra.mxu1 %v1035_v18 }
  0x61   : > { %699 = vmatmul.bf16.gmra.mxu2 %v1039_v19 }
  0x62   : > { %728 = vmatmul.bf16.gmra.mxu3 %v1043_v20 }
  0x6f   : > { %646 = vmatmul.bf16.gmra.mxu0 %v1047_v29 }
  0x70   : > { %675 = vmatmul.bf16.gmra.mxu1 %v1051_v30 }
  0x71   : > { %704 = vmatmul.bf16.gmra.mxu2 %v1055_v31 }
  0x72   : > { %733 = vmatmul.bf16.gmra.mxu3 %v1059_v32 }
  0x77   : > { %v1601_v34 = vpop.permute.xlu2 %769 }
  0x88   : > { %v1603_v39 = vpop.permute.xlu2 %774 }
  0x8e   : > { %v750_v33 = vpop.permute.xlu0 %749 }
  0x8f   : > { %v760_v35 = vpop.permute.xlu1 %759 }
  0x90   : > { %v806_v49 = vpop.permute.xlu2 %805 }
  0x96   : > { %v755_v38 = vpop.permute.xlu0 %754 }
  0x97   : > { %v765_v41 = vpop.permute.xlu1 %764 }
  0x98   : > { %v821_v24 = vpop.permute.xlu2 %820 }
  0x9e   : > { %v1605_v48 = vpop.permute.xlu0 %779 }
  0x9f   : > { %v1613_v59 = vpop.permute.xlu1 %784 }
  0xa6   : > { %v811_v0 = vpop.permute.xlu0 %810 }
  0xa7   : > { %v816_v10 = vpop.permute.xlu1 %815 }
  0xbc   : > { %v632_v36 = vpop.f32.mrf.mxu0 }
  0xbd   : > { %v661_v37 = vpop.f32.mrf.mxu1 }
  0xbe   : > { %v662_v40 = vadd.f32 %v661_v37, %v632_v36  ;;  %v826_v36 = vpop.permute.xlu0 %825 }
  0xc4   : > { %v690_v42 = vpop.f32.mrf.mxu2  ;;  %v634_v45 = vpop.f32.mrf.mxu0 }
  0xc5   : > { %v719_v43 = vpop.f32.mrf.mxu3  ;;  %v691_v44 = vadd.f32 %v690_v42, %v662_v40  ;;  %v663_v46 = vpop.f32.mrf.mxu1 }
  0xc6   : > { %v664_v51 = vadd.f32 %v663_v46, %v634_v45 }
  0xc7   : > { %v720_v47 = vadd.f32 %v719_v43, %v691_v44 }
  0xc9   : > { %v787_v50 = vmul.f32 %v750_v33, %v720_v47 }
  0xcb   : > { %v843_v52 = vadd.f32 %v806_v49, %v787_v50 }
  0xcc   : > { %v692_v53 = vpop.f32.mrf.mxu2  ;;  %v637_v57 = vpop.f32.mrf.mxu0 }
  0xcd   : > { %v721_v54 = vpop.f32.mrf.mxu3  ;;  %v851_v55 = vmax.f32 %v843_v52, 0.0  ;;  %v693_v56 = vadd.f32 %v692_v53, %v664_v51  ;;  %v666_v58 = vpop.f32.mrf.mxu1 }
  0xce   : > { %v667_v63 = vadd.f32 %v666_v58, %v637_v57  ;;  %v831_v51 = vpop.permute.xlu1 %830 }
  0xcf   : > { %v859_v60 = vpack.c.bf16 %v851_v55, %v851_v55  ;;  %v722_v61 = vadd.f32 %v721_v54, %v693_v56 }
  0xd1   : > { %868 = vst.msk [vmem:[%s1611_s28] sm:$0xf] %vm867_vm0, %v859_v60  ;;  %v788_v62 = vmul.f32 %v755_v38, %v722_v61 }
  0xd3   : > { %v844_v1 = vadd.f32 %v811_v0, %v788_v62  ;;  %v836_v62 = vpop.permute.xlu2 %835 }
  0xd4   : > { %v695_v2 = vpop.f32.mrf.mxu2  ;;  %v639_v6 = vpop.f32.mrf.mxu0 }
  0xd5   : > { %v724_v3 = vpop.f32.mrf.mxu3  ;;  %v852_v4 = vmax.f32 %v844_v1, 0.0  ;;  %v696_v5 = vadd.f32 %v695_v2, %v667_v63  ;;  %v668_v7 = vpop.f32.mrf.mxu1 }
  0xd6   : > { %v669_v12 = vadd.f32 %v668_v7, %v639_v6  ;;  %v841_v7 = vpop.permute.xlu0 %840 }
  0xd7   : > { %v860_v8 = vpack.c.bf16 %v852_v4, %v852_v4  ;;  %v725_v9 = vadd.f32 %v724_v3, %v696_v5 }
  0xd9   : > { %869 = vst.msk [vmem:[%s1611_s28 + $0x4] sm:$0xf] %vm867_vm0, %v860_v8  ;;  %v789_v11 = vmul.f32 %v760_v35, %v725_v9 }
  0xdb   : > { %v845_v13 = vadd.f32 %v816_v10, %v789_v11 }
  0xdc   : > { %v697_v14 = vpop.f32.mrf.mxu2  ;;  %v642_v18 = vpop.f32.mrf.mxu0 }
  0xdd   : > { %v726_v15 = vpop.f32.mrf.mxu3  ;;  %v853_v16 = vmax.f32 %v845_v13, 0.0  ;;  %v698_v17 = vadd.f32 %v697_v14, %v669_v12  ;;  %v671_v19 = vpop.f32.mrf.mxu1 }
  0xde   : > { %v672_v23 = vadd.f32 %v671_v19, %v642_v18 }
  0xdf   : > { %v861_v20 = vpack.c.bf16 %v853_v16, %v853_v16  ;;  %v727_v21 = vadd.f32 %v726_v15, %v698_v17 }
  0xe1   : > { %870 = vst.msk [vmem:[%s1611_s28 + $0x8] sm:$0xf] %vm867_vm0, %v861_v20  ;;  %v790_v22 = vmul.f32 %v765_v41, %v727_v21 }
  0xe3   : > { %v846_v25 = vadd.f32 %v821_v24, %v790_v22 }
  0xe4   : > { %v700_v26 = vpop.f32.mrf.mxu2  ;;  %v644_v30 = vpop.f32.mrf.mxu0 }
  0xe5   : > { %v729_v27 = vpop.f32.mrf.mxu3  ;;  %v854_v28 = vmax.f32 %v846_v25, 0.0  ;;  %v701_v29 = vadd.f32 %v700_v26, %v672_v23  ;;  %v673_v31 = vpop.f32.mrf.mxu1 }
  0xe6   : > { %v674_v38 = vadd.f32 %v673_v31, %v644_v30 }
  0xe7   : > { %v862_v32 = vpack.c.bf16 %v854_v28, %v854_v28  ;;  %v730_v33 = vadd.f32 %v729_v27, %v701_v29 }
  0xe9   : > { %871 = vst.msk [vmem:[%s1611_s28 + $0xc] sm:$0xf] %vm867_vm0, %v862_v32  ;;  %v791_v35 = vmul.f32 %v1601_v34, %v730_v33 }
  0xeb   : > { %v847_v37 = vadd.f32 %v826_v36, %v791_v35 }
  0xec   : > { %v702_v40 = vpop.f32.mrf.mxu2  ;;  %v647_v44 = vpop.f32.mrf.mxu0 }
  0xed   : > { %v731_v41 = vpop.f32.mrf.mxu3  ;;  %v855_v42 = vmax.f32 %v847_v37, 0.0  ;;  %v703_v43 = vadd.f32 %v702_v40, %v674_v38  ;;  %v676_v45 = vpop.f32.mrf.mxu1 }
  0xee   : > { %v677_v50 = vadd.f32 %v676_v45, %v647_v44 }
  0xef   : > { %v863_v46 = vpack.c.bf16 %v855_v42, %v855_v42  ;;  %v732_v47 = vadd.f32 %v731_v41, %v703_v43 }
  0xf1   : > { %872 = vst.msk [vmem:[%s1611_s28 + $0x10] sm:$0xf] %vm867_vm0, %v863_v46  ;;  %v792_v49 = vmul.f32 %v1603_v39, %v732_v47 }
  0xf3   : > { %v848_v52 = vadd.f32 %v831_v51, %v792_v49 }
  0xf4   : > { %v705_v34 = vpop.f32.mrf.mxu2  ;;  %v649_v58 = vpop.f32.mrf.mxu0 }
  0xf5   : > { %v734_v53 = vpop.f32.mrf.mxu3  ;;  %v856_v54 = vmax.f32 %v848_v52, 0.0  ;;  %v706_v55 = vadd.f32 %v705_v34, %v677_v50  ;;  %v678_v60 = vpop.f32.mrf.mxu1 }
  0xf6   : > { %v679_v39 = vadd.f32 %v678_v60, %v649_v58 }
  0xf7   : > { %v864_v56 = vpack.c.bf16 %v856_v54, %v856_v54  ;;  %v735_v57 = vadd.f32 %v734_v53, %v706_v55 }
  0xf9   : > { %873 = vst.msk [vmem:[%s1611_s28 + $0x14] sm:$0xf] %vm867_vm0, %v864_v56  ;;  %v793_v61 = vmul.f32 %v1605_v48, %v735_v57 }
  0xfb   : > { %v849_v63 = vadd.f32 %v836_v62, %v793_v61 }
  0xfc   : > { %v707_v0 = vpop.f32.mrf.mxu2 }
  0xfd   : > { %v857_v1 = vmax.f32 %v849_v63, 0.0  ;;  %v708_v2 = vadd.f32 %v707_v0, %v679_v39  ;;  %v736_v3 = vpop.f32.mrf.mxu3 }
  0xff   : > { %v865_v4 = vpack.c.bf16 %v857_v1, %v857_v1  ;;  %v737_v5 = vadd.f32 %v736_v3, %v708_v2 }
 0x101   : > { %874 = vst.msk [vmem:[%s1611_s28 + $0x18] sm:$0xf] %vm867_vm0, %v865_v4  ;;  %v794_v6 = vmul.f32 %v1613_v59, %v737_v5 }
 0x103   : > { %v850_v8 = vadd.f32 %v841_v7, %v794_v6 }
 0x105   : > { %v858_v9 = vmax.f32 %v850_v8, 0.0 }
 0x107   : > { %v866_v10 = vpack.c.bf16 %v858_v9, %v858_v9 }
 0x109   : > { %875 = vst.msk [vmem:[%s1611_s28 + $0x1c] sm:$0xf] %vm867_vm0, %v866_v10 }
 0x10a PF: > { %s17_s20 = sadd.s32 1, %s1382_s20   ;;  %s1660_s15 = smov %s1366_s16 }
 0x10b   : > { %p14_p0 = scmp.ge.s32.totalorder %s17_s20, 6   ;;  %s1661_s16 = smov %s1370_s17 }
 0x10c   : > { %s1662_s17 = smov %s1461_s27  ;;  %s1663_s18 = smov %s1378_s19 }
 0x10d   : > { %s1664_s19 = smov %s1666_s22  ;;  %16 = sbr.rel (!%p14_p0) target bundleno = 4 (0x4), region = 79 }
 0x112   :  { %903 = vsyncpa [#allocation3], 1 }
 0x113   :  { %905 = vsyncpa [#allocation3 + $0x1], 1 }

// kernel: generator_forward.5
= control target key start
LH: loop header
LB: loop body
LE: loop exit
PB: predicated region body
PF: predicated region fallthrough
CT: control target
= control target key end

     0   :  { %s823_s15 = smov 0   ;;  %s825_s16 = smov 0   ;;  %s906_s0 = inlined_call_operand.vmem [shape: bf16[4,32,256], index: 0, kind: input, shape index: {}]   ;;  %s907_s1 = inlined_call_operand.vmem [shape: bf16[4,256,128], index: 1, kind: input, shape index: {}]   ;;  %s908_s2 = inlined_call_operand.vmem [shape: f32[32,1], index: 2, kind: input, shape index: {}]   ;;  %s909_s3 = inlined_call_operand.vmem [shape: f32[32,1], index: 3, kind: input, shape index: {}]   ;;  %s910_s4 = inlined_call_operand.vmem [shape: bf16[4,32,128], index: 4, kind: output, shape index: {}]  }
   0x1   :  { %s827_s17 = smov 0  }
   0x2 LB: > { %s26_s18 = sadd.s32 1, %s791_s16  ;;  %p606_p0 = scmp.ge.s32.totalorder %s795_s17, 1  ;;  %s795_s17 = sphi %s827_s17, %s14_s17   ;;  %s791_s16 = sphi %s825_s16, %s912_s16   ;;  %s787_s15 = sphi %s823_s15, %s911_s15  }
   0x3   : > { %p28_p1 = scmp.ge.s32.totalorder %s26_s18, 4  ;;  %p191_p2 = scmp.lt.s32.totalorder %s795_s17, 5 }
   0x5   : > { %s914_s18 = smov (%p28_p1, %s26_s18), 0  ;;  %p192_p3 = pnand %p606_p0, %p191_p2 }
   0x6   : > { %p228_p4 = scmp.lt.s32.totalorder (!%p192_p3), %s787_s15, 3 }
   0x7   : > { %195 = sbr.rel (%p192_p3) target bundleno = 199 (0xc7), region = 36 }
   0xc   : > { %v441_v0 = vld [vmem:[%s908_s2 + $0x10] sm:$0xff]  ;;  %v439_v1 = vld [vmem:[%s908_s2] sm:$0xff]  ;;  %s916_s15 = smov (!%p228_p4, %s787_s15), 3  ;;  %v797_v2 = vmov 0   ;;  %v442_v9 = vld [vmem:[%s908_s2 + $0x18] sm:$0xff] }
   0xd   : > { %771 = vset.pattern.permute.xlu1 %v797_v2  ;;  %770 = vset.pattern.permute.xlu0 %v797_v2  ;;  %s696_s23 = sshll.u32 %s916_s15, 7  ;;  %v440_v10 = vld [vmem:[%s908_s2 + $0x8] sm:$0xff]  ;;  %v467_v11 = vld [vmem:[%s909_s3] sm:$0xff]  ;;  %v470_v15 = vld [vmem:[%s909_s3 + $0x18] sm:$0xff]  ;;  %s695_s13 = sshll.u32 %s916_s15, 5 }
   0xe   : > { %455 = vperm.xlu1 %771, %v441_v0   ;;  %445 = vperm.xlu0 %770, %v439_v1   ;;  %s853_s26 = scalar_lea.vmem %s907_s1, %s696_s23  ;;  %v469_v16 = vld [vmem:[%s909_s3 + $0x10] sm:$0xff]  ;;  %v468_v18 = vld [vmem:[%s909_s3 + $0x8] sm:$0xff]  ;;  %s232_s20 = scalar_lea.vmem %s906_s0, %s695_s13 }
   0xf   : > { %772 = vset.pattern.permute.xlu2 %v797_v2  ;;  %v709_v3 = vld [vmem:[%s853_s26 + $0x38] sm:$0xff]  ;;  %v708_v5 = vld [vmem:[%s853_s26 + $0x30] sm:$0xff]  ;;  %v707_v7 = vld [vmem:[%s853_s26 + $0x28] sm:$0xff]  ;;  %s697_s21 = sshll.u32 %s916_s15, 4 }
  0x10   : > { %v717_v4 = vld [vmem:[%s853_s26 + $0x78] sm:$0xff]  ;;  %401 = vmatpush.bf16.msra.mxu0 %v709_v3  ;;  %729 = vmatpush.bf16.msra.mxu2 %v709_v3  ;;  %v716_v6 = vld [vmem:[%s853_s26 + $0x70] sm:$0xff]  ;;  %v715_v8 = vld [vmem:[%s853_s26 + $0x68] sm:$0xff]  ;;  %s248_s24 = scalar_lea.vmem %s910_s4, %s697_s21 }
  0x11   : > { %420 = vmatpush.bf16.msra.mxu1 %v717_v4  ;;  %737 = vmatpush.bf16.msra.mxu3 %v717_v4  ;;  %v706_v12 = vld [vmem:[%s853_s26 + $0x20] sm:$0xff]  ;;  %v705_v14 = vld [vmem:[%s853_s26 + $0x18] sm:$0xff]  ;;  %v704_v19 = vld [vmem:[%s853_s26 + $0x10] sm:$0xff] }
  0x12   : > { %v714_v13 = vld [vmem:[%s853_s26 + $0x60] sm:$0xff]  ;;  %473 = vperm.xlu2 %772, %v467_v11   ;;  %v713_v17 = vld [vmem:[%s853_s26 + $0x58] sm:$0xff]  ;;  %v712_v20 = vld [vmem:[%s853_s26 + $0x50] sm:$0xff] }
  0x13   : > { %v703_v21 = vld [vmem:[%s853_s26 + $0x8] sm:$0xff]  ;;  %v702_v23 = vld [vmem:[%s853_s26] sm:$0xff]  ;;  %v623_v27 = vld [vmem:[%s232_s20 + $0x10] sm:$0xf] }
  0x14   : > { %402 = vmatpush.bf16.msra.mxu0 %v708_v5  ;;  %730 = vmatpush.bf16.msra.mxu2 %v708_v5  ;;  %v711_v22 = vld [vmem:[%s853_s26 + $0x48] sm:$0xff]  ;;  %v710_v24 = vld [vmem:[%s853_s26 + $0x40] sm:$0xff]  ;;  %v701_v28 = vld [vmem:[%s232_s20 + $0x14] sm:$0xf0] }
  0x15   : > { %421 = vmatpush.bf16.msra.mxu1 %v716_v6  ;;  %738 = vmatpush.bf16.msra.mxu3 %v716_v6  ;;  %v615_v25 = vld [vmem:[%s232_s20] sm:$0xf]  ;;  %v699_v26 = vld [vmem:[%s232_s20 + $0x4] sm:$0xf0]  ;;  %v698_v29 = vld [vmem:[%s232_s20 + $0x4] sm:$0xf]  ;;  %v624_v34 = vor.u32 %v701_v28, %v623_v27 }
  0x16   : > { %460 = vperm.xlu1 %771, %v442_v9   ;;  %450 = vperm.xlu0 %770, %v440_v10   ;;  %v617_v30 = vld [vmem:[%s232_s20 + $0x8] sm:$0xf0]  ;;  %v700_v31 = vld [vmem:[%s232_s20 + $0x14] sm:$0xf]  ;;  %v625_v32 = vld [vmem:[%s232_s20 + $0x18] sm:$0xf0]  ;;  %v616_v33 = vor.u32 %v699_v26, %v615_v25 }
  0x17   : > { %v620_v35 = vor.u32 %v698_v29, %v617_v30  ;;  %v628_v36 = vor.u32 %v700_v31, %v625_v32 }
  0x18   : > { %403 = vmatpush.bf16.msra.mxu0 %v707_v7  ;;  %731 = vmatpush.bf16.msra.mxu2 %v707_v7 }
  0x19   : > { %422 = vmatpush.bf16.msra.mxu1 %v715_v8  ;;  %739 = vmatpush.bf16.msra.mxu3 %v715_v8 }
  0x1a   : > { %478 = vperm.xlu2 %772, %v468_v18  }
  0x1c   : > { %404 = vmatpush.bf16.msra.mxu0 %v706_v12  ;;  %732 = vmatpush.bf16.msra.mxu2 %v706_v12 }
  0x1d   : > { %423 = vmatpush.bf16.msra.mxu1 %v714_v13  ;;  %740 = vmatpush.bf16.msra.mxu3 %v714_v13 }
  0x1e   : > { %488 = vperm.xlu1 %771, %v470_v15   ;;  %483 = vperm.xlu0 %770, %v469_v16  }
  0x20   : > { %405 = vmatpush.bf16.msra.mxu0 %v705_v14  ;;  %733 = vmatpush.bf16.msra.mxu2 %v705_v14 }
  0x21   : > { %424 = vmatpush.bf16.msra.mxu1 %v713_v17  ;;  %741 = vmatpush.bf16.msra.mxu3 %v713_v17 }
  0x24   : > { %406 = vmatpush.bf16.msra.mxu0 %v704_v19  ;;  %734 = vmatpush.bf16.msra.mxu2 %v704_v19 }
  0x25   : > { %425 = vmatpush.bf16.msra.mxu1 %v712_v20  ;;  %742 = vmatpush.bf16.msra.mxu3 %v712_v20 }
  0x28   : > { %407 = vmatpush.bf16.msra.mxu0 %v703_v21  ;;  %735 = vmatpush.bf16.msra.mxu2 %v703_v21 }
  0x29   : > { %426 = vmatpush.bf16.msra.mxu1 %v711_v22  ;;  %743 = vmatpush.bf16.msra.mxu3 %v711_v22 }
  0x2c   : > { %408 = vmatpush.bf16.msra.mxu0 %v702_v23  ;;  %736 = vmatpush.bf16.msra.mxu2 %v702_v23 }
  0x2d   : > { %427 = vmatpush.bf16.msra.mxu1 %v710_v24  ;;  %744 = vmatpush.bf16.msra.mxu3 %v710_v24 }
  0x2f   : > { %409 = vmatmul.bf16.vlgmr.msra.gmra.mxu0 %v616_v33  ;;  %414 = vmatmul.bf16.vlgmr.msra.gmra.mxu2 %v624_v34 }
  0x30   : > { %428 = vmatmul.bf16.vlgmr.msra.gmra.mxu1 %v620_v35  ;;  %433 = vmatmul.bf16.vlgmr.msra.gmra.mxu3 %v628_v36 }
  0x6c   : > { %v474_v41 = vpop.permute.xlu2 %473 }
  0x74   : > { %v479_v54 = vpop.permute.xlu2 %478 }
  0x80   : > { %v446_v37 = vpop.permute.xlu0 %445  ;;  %v456_v38 = vpop.permute.xlu1 %455 }
  0x88   : > { %v451_v44 = vpop.permute.xlu0 %450  ;;  %v461_v48 = vpop.permute.xlu1 %460 }
  0x90   : > { %v484_v62 = vpop.permute.xlu0 %483  ;;  %v489_v2 = vpop.permute.xlu1 %488 }
  0xac   : > { %v410_v39 = vpop.f32.mrf.mxu0 }
  0xad   : > { %v429_v40 = vpop.f32.mrf.mxu1 }
  0xae   : > { %v430_v42 = vadd.f32 %v429_v40, %v410_v39 }
  0xb0   : > { %v463_v46 = vmul.f32 %v446_v37, %v430_v42 }
  0xb2   : > { %v415_v43 = vpop.f32.mrf.mxu2  ;;  %v491_v52 = vadd.f32 %v474_v41, %v463_v46 }
  0xb3   : > { %v434_v45 = vpop.f32.mrf.mxu3 }
  0xb4   : > { %v412_v47 = vpop.f32.mrf.mxu0  ;;  %v435_v50 = vadd.f32 %v434_v45, %v415_v43  ;;  %v495_v59 = vmax.f32 %v491_v52, 0.0 }
  0xb5   : > { %v431_v49 = vpop.f32.mrf.mxu1 }
  0xb6   : > { %v432_v51 = vadd.f32 %v431_v49, %v412_v47  ;;  %v465_v55 = vmul.f32 %v456_v38, %v435_v50 }
  0xb8   : > { %v464_v53 = vmul.f32 %v451_v44, %v432_v51  ;;  %v493_v63 = vadd.f32 %v484_v62, %v465_v55 }
  0xba   : > { %v492_v56 = vadd.f32 %v479_v54, %v464_v53  ;;  %v417_v57 = vpop.f32.mrf.mxu2  ;;  %v497_v4 = vmax.f32 %v493_v63, 0.0 }
  0xbb   : > { %v436_v58 = vpop.f32.mrf.mxu3 }
  0xbc   : > { %v496_v60 = vmax.f32 %v492_v56, 0.0  ;;  %v437_v61 = vadd.f32 %v436_v58, %v417_v57 }
  0xbe   : > { %v721_v0 = vpack.c.bf16 %v496_v60, %v495_v59  ;;  %v466_v1 = vmul.f32 %v461_v48, %v437_v61 }
  0xc0   : > { %722 = vst [vmem:[%s248_s24] sm:$0xff] %v721_v0   ;;  %v494_v3 = vadd.f32 %v489_v2, %v466_v1 }
  0xc2   : > { %v498_v5 = vmax.f32 %v494_v3, 0.0 }
  0xc4   : > { %v726_v6 = vpack.c.bf16 %v498_v5, %v497_v4 }
  0xc6   : > { %728 = vst [vmem:[%s248_s24 + $0x8] sm:$0xff] %v726_v6  }
  0xc7 PF: > { %s14_s17 = sadd.s32 1, %s795_s17   ;;  %s911_s15 = smov %s791_s16 }
  0xc8   : > { %p11_p5 = scmp.ge.s32.totalorder %s14_s17, 6   ;;  %s912_s16 = smov %s914_s18 }
  0xca   :  { %13 = sbr.rel (!%p11_p5) target bundleno = 2 (0x2), region = 69 }

// kernel: generator_forward.6
= control target key start
LH: loop header
LB: loop body
LE: loop exit
PB: predicated region body
PF: predicated region fallthrough
CT: control target
= control target key end

     0   :  { %s926_s15 = smov 0   ;;  %s928_s16 = smov 0   ;;  %s1051_s0 = inlined_call_operand.vmem [shape: bf16[4,16,128], index: 0, kind: input, shape index: {}]   ;;  %s1052_s1 = inlined_call_operand.vmem [shape: bf16[4,128,512], index: 1, kind: input, shape index: {}]   ;;  %s1053_s2 = inlined_call_operand.vmem [shape: f32[16,1], index: 2, kind: input, shape index: {}]   ;;  %s1054_s3 = inlined_call_operand.vmem [shape: f32[16,1], index: 3, kind: input, shape index: {}]   ;;  %s1055_s4 = inlined_call_operand.vmem [shape: bf16[4,16,512], index: 4, kind: output, shape index: {}]  }
   0x1   :  { %s930_s17 = smov 0  }
   0x2 LB: > { %s26_s18 = sadd.s32 1, %s894_s16  ;;  %p672_p0 = scmp.ge.s32.totalorder %s898_s17, 1  ;;  %s898_s17 = sphi %s930_s17, %s14_s17   ;;  %s894_s16 = sphi %s928_s16, %s1057_s16   ;;  %s890_s15 = sphi %s926_s15, %s1056_s15  }
   0x3   : > { %p28_p1 = scmp.ge.s32.totalorder %s26_s18, 4  ;;  %p193_p2 = scmp.lt.s32.totalorder %s898_s17, 5 }
   0x5   : > { %s1059_s18 = smov (%p28_p1, %s26_s18), 0  ;;  %p194_p3 = pnand %p672_p0, %p193_p2 }
   0x6   : > { %p232_p4 = scmp.lt.s32.totalorder (!%p194_p3), %s890_s15, 3 }
   0x7   : > { %197 = sbr.rel (%p194_p3) target bundleno = 200 (0xc8), region = 36 }
   0xc   : > { %s1061_s15 = smov (!%p232_p4, %s890_s15), 3 }
   0xd   : > { %s814_s19 = sshll.u32 %s1061_s15, 8  ;;  %s813_s27 = sshll.u32 %s1061_s15, 3 }
   0xe   : > { %s950_s22 = scalar_lea.vmem %s1052_s1, %s814_s19  ;;  %s236_s30 = scalar_lea.vmem %s1051_s0, %s813_s27 }
   0xf   : > { %v797_v0 = vld [vmem:[%s950_s22 + $0xe0] sm:$0xf]  ;;  %v847_v1 = vld [vmem:[%s950_s22 + $0xec] sm:$0xf0]  ;;  %v845_v2 = vld [vmem:[%s950_s22 + $0xe4] sm:$0xf] }
  0x10   : > { %v798_v3 = vor.u32 %v847_v1, %v797_v0  ;;  %v799_v4 = vld [vmem:[%s950_s22 + $0xf0] sm:$0xf0]  ;;  %v805_v5 = vld [vmem:[%s950_s22 + $0xe8] sm:$0xf]  ;;  %v848_v6 = vld [vmem:[%s950_s22 + $0xf4] sm:$0xf0] }
  0x11   : > { %v802_v7 = vor.u32 %v845_v2, %v799_v4  ;;  %v806_v8 = vor.u32 %v848_v6, %v805_v5  ;;  %v846_v9 = vld [vmem:[%s950_s22 + $0xec] sm:$0xf]  ;;  %v807_v10 = vld [vmem:[%s950_s22 + $0xf8] sm:$0xf0]  ;;  %v781_v11 = vld [vmem:[%s950_s22 + $0xc0] sm:$0xf] }
  0x12   : > { %457 = vmatpush.bf16.msra.mxu0 %v798_v3  ;;  %v810_v12 = vor.u32 %v846_v9, %v807_v10  ;;  %v843_v13 = vld [vmem:[%s950_s22 + $0xcc] sm:$0xf0]  ;;  %v841_v14 = vld [vmem:[%s950_s22 + $0xc4] sm:$0xf]  ;;  %v783_v15 = vld [vmem:[%s950_s22 + $0xd0] sm:$0xf0] }
  0x13   : > { %471 = vmatpush.bf16.msra.mxu1 %v802_v7  ;;  %485 = vmatpush.bf16.msra.mxu2 %v806_v8  ;;  %v782_v16 = vor.u32 %v843_v13, %v781_v11  ;;  %v786_v17 = vor.u32 %v841_v14, %v783_v15  ;;  %v789_v18 = vld [vmem:[%s950_s22 + $0xc8] sm:$0xf]  ;;  %v844_v19 = vld [vmem:[%s950_s22 + $0xd4] sm:$0xf0]  ;;  %v842_v20 = vld [vmem:[%s950_s22 + $0xcc] sm:$0xf] }
  0x14   : > { %499 = vmatpush.bf16.msra.mxu3 %v810_v12  ;;  %v790_v21 = vor.u32 %v844_v19, %v789_v18  ;;  %v791_v22 = vld [vmem:[%s950_s22 + $0xd8] sm:$0xf0]  ;;  %v765_v23 = vld [vmem:[%s950_s22 + $0xa0] sm:$0xf]  ;;  %v839_v24 = vld [vmem:[%s950_s22 + $0xac] sm:$0xf0] }
  0x15   : > { %v794_v25 = vor.u32 %v842_v20, %v791_v22  ;;  %v837_v26 = vld [vmem:[%s950_s22 + $0xa4] sm:$0xf]  ;;  %v767_v27 = vld [vmem:[%s950_s22 + $0xb0] sm:$0xf0]  ;;  %v773_v28 = vld [vmem:[%s950_s22 + $0xa8] sm:$0xf]  ;;  %v766_v29 = vor.u32 %v839_v24, %v765_v23 }
  0x16   : > { %458 = vmatpush.bf16.msra.mxu0 %v782_v16  ;;  %v840_v30 = vld [vmem:[%s950_s22 + $0xb4] sm:$0xf0]  ;;  %v838_v31 = vld [vmem:[%s950_s22 + $0xac] sm:$0xf]  ;;  %v775_v32 = vld [vmem:[%s950_s22 + $0xb8] sm:$0xf0]  ;;  %v770_v33 = vor.u32 %v837_v26, %v767_v27 }
  0x17   : > { %472 = vmatpush.bf16.msra.mxu1 %v786_v17  ;;  %486 = vmatpush.bf16.msra.mxu2 %v790_v21  ;;  %v774_v34 = vor.u32 %v840_v30, %v773_v28  ;;  %v749_v35 = vld [vmem:[%s950_s22 + $0x80] sm:$0xf]  ;;  %v835_v36 = vld [vmem:[%s950_s22 + $0x8c] sm:$0xf0]  ;;  %v833_v37 = vld [vmem:[%s950_s22 + $0x84] sm:$0xf]  ;;  %v778_v38 = vor.u32 %v838_v31, %v775_v32 }
  0x18   : > { %500 = vmatpush.bf16.msra.mxu3 %v794_v25  ;;  %v751_v39 = vld [vmem:[%s950_s22 + $0x90] sm:$0xf0]  ;;  %v757_v40 = vld [vmem:[%s950_s22 + $0x88] sm:$0xf]  ;;  %v836_v41 = vld [vmem:[%s950_s22 + $0x94] sm:$0xf0]  ;;  %v750_v44 = vor.u32 %v835_v36, %v749_v35 }
  0x19   : > { %v834_v42 = vld [vmem:[%s950_s22 + $0x8c] sm:$0xf]  ;;  %v759_v43 = vld [vmem:[%s950_s22 + $0x98] sm:$0xf0]  ;;  %v754_v45 = vor.u32 %v833_v37, %v751_v39  ;;  %v758_v46 = vor.u32 %v836_v41, %v757_v40  ;;  %v733_v47 = vld [vmem:[%s950_s22 + $0x60] sm:$0xf] }
  0x1a   : > { %459 = vmatpush.bf16.msra.mxu0 %v766_v29  ;;  %v831_v48 = vld [vmem:[%s950_s22 + $0x6c] sm:$0xf0]  ;;  %v829_v49 = vld [vmem:[%s950_s22 + $0x64] sm:$0xf]  ;;  %v762_v50 = vor.u32 %v834_v42, %v759_v43  ;;  %v735_v51 = vld [vmem:[%s950_s22 + $0x70] sm:$0xf0] }
  0x1b   : > { %473 = vmatpush.bf16.msra.mxu1 %v770_v33  ;;  %487 = vmatpush.bf16.msra.mxu2 %v774_v34  ;;  %v741_v52 = vld [vmem:[%s950_s22 + $0x68] sm:$0xf]  ;;  %v832_v53 = vld [vmem:[%s950_s22 + $0x74] sm:$0xf0]  ;;  %v830_v54 = vld [vmem:[%s950_s22 + $0x6c] sm:$0xf]  ;;  %v734_v56 = vor.u32 %v831_v48, %v733_v47  ;;  %v738_v57 = vor.u32 %v829_v49, %v735_v51 }
  0x1c   : > { %501 = vmatpush.bf16.msra.mxu3 %v778_v38  ;;  %v743_v55 = vld [vmem:[%s950_s22 + $0x78] sm:$0xf0]  ;;  %v742_v58 = vor.u32 %v832_v53, %v741_v52  ;;  %v717_v59 = vld [vmem:[%s950_s22 + $0x40] sm:$0xf]  ;;  %v827_v60 = vld [vmem:[%s950_s22 + $0x4c] sm:$0xf0] }
  0x1d   : > { %v825_v61 = vld [vmem:[%s950_s22 + $0x44] sm:$0xf]  ;;  %v746_v62 = vor.u32 %v830_v54, %v743_v55  ;;  %v719_v63 = vld [vmem:[%s950_s22 + $0x50] sm:$0xf0]  ;;  %v725_v0 = vld [vmem:[%s950_s22 + $0x48] sm:$0xf]  ;;  %v718_v4 = vor.u32 %v827_v60, %v717_v59 }
  0x1e   : > { %460 = vmatpush.bf16.msra.mxu0 %v750_v44  ;;  %v828_v1 = vld [vmem:[%s950_s22 + $0x54] sm:$0xf0]  ;;  %v826_v2 = vld [vmem:[%s950_s22 + $0x4c] sm:$0xf]  ;;  %v727_v3 = vld [vmem:[%s950_s22 + $0x58] sm:$0xf0]  ;;  %v722_v6 = vor.u32 %v825_v61, %v719_v63 }
  0x1f   : > { %474 = vmatpush.bf16.msra.mxu1 %v754_v45  ;;  %488 = vmatpush.bf16.msra.mxu2 %v758_v46  ;;  %v701_v5 = vld [vmem:[%s950_s22 + $0x20] sm:$0xf]  ;;  %v726_v7 = vor.u32 %v828_v1, %v725_v0  ;;  %v823_v8 = vld [vmem:[%s950_s22 + $0x2c] sm:$0xf0]  ;;  %v821_v9 = vld [vmem:[%s950_s22 + $0x24] sm:$0xf]  ;;  %v730_v11 = vor.u32 %v826_v2, %v727_v3 }
  0x20   : > { %502 = vmatpush.bf16.msra.mxu3 %v762_v50  ;;  %v703_v10 = vld [vmem:[%s950_s22 + $0x30] sm:$0xf0]  ;;  %v709_v12 = vld [vmem:[%s950_s22 + $0x28] sm:$0xf]  ;;  %v824_v13 = vld [vmem:[%s950_s22 + $0x34] sm:$0xf0]  ;;  %v702_v19 = vor.u32 %v823_v8, %v701_v5 }
  0x21   : > { %v513_v14 = vld [vmem:[%s1053_s2] sm:$0xff]  ;;  %v822_v15 = vld [vmem:[%s950_s22 + $0x2c] sm:$0xf]  ;;  %v711_v16 = vld [vmem:[%s950_s22 + $0x38] sm:$0xf0]  ;;  %v900_v17 = vmov 0   ;;  %v706_v20 = vor.u32 %v821_v9, %v703_v10  ;;  %v710_v21 = vor.u32 %v824_v13, %v709_v12 }
  0x22   : > { %461 = vmatpush.bf16.msra.mxu0 %v734_v56  ;;  %874 = vset.pattern.permute.xlu0 %v900_v17  ;;  %v533_v18 = vld [vmem:[%s1054_s3] sm:$0xff]  ;;  %v819_v23 = vld [vmem:[%s950_s22 + $0xc] sm:$0xf0]  ;;  %v714_v25 = vor.u32 %v822_v15, %v711_v16  ;;  %v687_v26 = vld [vmem:[%s950_s22 + $0x10] sm:$0xf0]  ;;  %s815_s9 = sshll.u32 %s1061_s15, 5 }
  0x23   : > { %475 = vmatpush.bf16.msra.mxu1 %v738_v57  ;;  %489 = vmatpush.bf16.msra.mxu2 %v742_v58  ;;  %v685_v22 = vld [vmem:[%s950_s22] sm:$0xf]  ;;  %v817_v24 = vld [vmem:[%s950_s22 + $0x4] sm:$0xf]  ;;  %v693_v27 = vld [vmem:[%s950_s22 + $0x8] sm:$0xf]  ;;  %s1036_s12 = scalar_lea.vmem %s1055_s4, %s815_s9 }
  0x24   : > { %503 = vmatpush.bf16.msra.mxu3 %v746_v62  ;;  %875 = vset.pattern.permute.xlu1 %v900_v17  ;;  %v820_v28 = vld [vmem:[%s950_s22 + $0x14] sm:$0xf0]  ;;  %v818_v29 = vld [vmem:[%s950_s22 + $0xc] sm:$0xf]  ;;  %v695_v30 = vld [vmem:[%s950_s22 + $0x18] sm:$0xf0]  ;;  %v686_v31 = vor.u32 %v819_v23, %v685_v22  ;;  %v690_v32 = vor.u32 %v817_v24, %v687_v26 }
  0x25   : > { %517 = vperm.xlu0 %874, %v513_v14   ;;  %537 = vperm.xlu1 %875, %v533_v18   ;;  %v694_v33 = vor.u32 %v820_v28, %v693_v27  ;;  %v514_v34 = vld [vmem:[%s1053_s2 + $0x8] sm:$0xff]  ;;  %v698_v35 = vor.u32 %v818_v29, %v695_v30  ;;  %v816_v36 = vld [vmem:[%s236_s30] sm:$0xff] }
  0x26   : > { %462 = vmatpush.bf16.msra.mxu0 %v718_v4  ;;  %v534_v37 = vld [vmem:[%s1054_s3 + $0x8] sm:$0xff] }
  0x27   : > { %476 = vmatpush.bf16.msra.mxu1 %v722_v6  ;;  %490 = vmatpush.bf16.msra.mxu2 %v726_v7 }
  0x28   : > { %504 = vmatpush.bf16.msra.mxu3 %v730_v11 }
  0x2a   : > { %463 = vmatpush.bf16.msra.mxu0 %v702_v19 }
  0x2b   : > { %477 = vmatpush.bf16.msra.mxu1 %v706_v20  ;;  %491 = vmatpush.bf16.msra.mxu2 %v710_v21 }
  0x2c   : > { %505 = vmatpush.bf16.msra.mxu3 %v714_v25 }
  0x2d   : > { %522 = vperm.xlu0 %874, %v514_v34   ;;  %542 = vperm.xlu1 %875, %v534_v37  }
  0x2e   : > { %464 = vmatpush.bf16.msra.mxu0 %v686_v31 }
  0x2f   : > { %478 = vmatpush.bf16.msra.mxu1 %v690_v32  ;;  %492 = vmatpush.bf16.msra.mxu2 %v694_v33 }
  0x30   : > { %506 = vmatpush.bf16.msra.mxu3 %v698_v35 }
  0x31   : > { %465 = vmatmul.bf16.vlgmr.msra.gmra.mxu0 %v816_v36 }
  0x32   : > { %479 = vmatmul.bf16.vlgmr.msra.gmra.mxu1 %v816_v36  ;;  %493 = vmatmul.bf16.vlgmr.msra.gmra.mxu2 %v816_v36 }
  0x33   : > { %507 = vmatmul.bf16.vlgmr.msra.gmra.mxu3 %v816_v36 }
  0x97   : > { %v518_v38 = vpop.permute.xlu0 %517  ;;  %v538_v39 = vpop.permute.xlu1 %537 }
  0x9f   : > { %v523_v48 = vpop.permute.xlu0 %522  ;;  %v543_v58 = vpop.permute.xlu1 %542 }
  0xae   : > { %v466_v40 = vpop.f32.mrf.mxu0 }
  0xaf   : > { %v525_v41 = vmul.f32 %v518_v38, %v466_v40  ;;  %v480_v42 = vpop.f32.mrf.mxu1 }
  0xb0   : > { %v526_v43 = vmul.f32 %v518_v38, %v480_v42 }
  0xb1   : > { %v545_v44 = vadd.f32 %v538_v39, %v525_v41 }
  0xb2   : > { %v546_v45 = vadd.f32 %v538_v39, %v526_v43 }
  0xb3   : > { %v553_v46 = vmax.f32 %v545_v44, 0.0 }
  0xb4   : > { %v554_v47 = vmax.f32 %v546_v45, 0.0 }
  0xb5   : > { %v494_v49 = vpop.f32.mrf.mxu2 }
  0xb6   : > { %v561_v50 = vpack.c.bf16 %v554_v47, %v553_v46  ;;  %v527_v51 = vmul.f32 %v518_v38, %v494_v49  ;;  %v508_v52 = vpop.f32.mrf.mxu3  ;;  %v468_v53 = vpop.f32.mrf.mxu0 }
  0xb7   : > { %v528_v54 = vmul.f32 %v518_v38, %v508_v52  ;;  %v529_v55 = vmul.f32 %v523_v48, %v468_v53  ;;  %v482_v56 = vpop.f32.mrf.mxu1 }
  0xb8   : > { %565 = vst [vmem:[%s1036_s12] sm:$0xff] %v561_v50  ;;  %v547_v57 = vadd.f32 %v538_v39, %v527_v51  ;;  %v530_v59 = vmul.f32 %v523_v48, %v482_v56 }
  0xb9   : > { %v548_v60 = vadd.f32 %v538_v39, %v528_v54  ;;  %v549_v61 = vadd.f32 %v543_v58, %v529_v55 }
  0xba   : > { %v555_v62 = vmax.f32 %v547_v57, 0.0  ;;  %v550_v63 = vadd.f32 %v543_v58, %v530_v59 }
  0xbb   : > { %v556_v0 = vmax.f32 %v548_v60, 0.0  ;;  %v557_v1 = vmax.f32 %v549_v61, 0.0 }
  0xbc   : > { %v558_v2 = vmax.f32 %v550_v63, 0.0 }
  0xbd   : > { %v562_v3 = vpack.c.bf16 %v556_v0, %v555_v62  ;;  %v496_v4 = vpop.f32.mrf.mxu2 }
  0xbe   : > { %v563_v5 = vpack.c.bf16 %v558_v2, %v557_v1  ;;  %v531_v6 = vmul.f32 %v523_v48, %v496_v4  ;;  %v510_v7 = vpop.f32.mrf.mxu3 }
  0xbf   : > { %566 = vst [vmem:[%s1036_s12 + $0x8] sm:$0xff] %v562_v3  ;;  %v532_v8 = vmul.f32 %v523_v48, %v510_v7 }
  0xc0   : > { %567 = vst [vmem:[%s1036_s12 + $0x10] sm:$0xff] %v563_v5  ;;  %v551_v9 = vadd.f32 %v543_v58, %v531_v6 }
  0xc1   : > { %v552_v10 = vadd.f32 %v543_v58, %v532_v8 }
  0xc2   : > { %v559_v11 = vmax.f32 %v551_v9, 0.0 }
  0xc3   : > { %v560_v12 = vmax.f32 %v552_v10, 0.0 }
  0xc5   : > { %v564_v13 = vpack.c.bf16 %v560_v12, %v559_v11 }
  0xc7   : > { %568 = vst [vmem:[%s1036_s12 + $0x18] sm:$0xff] %v564_v13 }
  0xc8 PF: > { %s14_s17 = sadd.s32 1, %s898_s17   ;;  %s1056_s15 = smov %s894_s16 }
  0xc9   : > { %p11_p5 = scmp.ge.s32.totalorder %s14_s17, 6   ;;  %s1057_s16 = smov %s1059_s18 }
  0xcb   :  { %13 = sbr.rel (!%p11_p5) target bundleno = 2 (0x2), region = 69 }

// kernel: generator_forward.7
= control target key start
LH: loop header
LB: loop body
LE: loop exit
PB: predicated region body
PF: predicated region fallthrough
CT: control target
= control target key end

     0   :  { %s1518_s15 = smov 0   ;;  %s1520_s16 = smov 0   ;;  %s1785_s0 = inlined_call_operand.vmem [shape: bf16[4,3,64], index: 0, kind: input, shape index: {}]   ;;  %s1786_s1 = inlined_call_operand.vmem [shape: bf16[4,64,2048], index: 1, kind: input, shape index: {}]   ;;  %s1787_s2 = inlined_call_operand.vmem [shape: f32[3,1], index: 2, kind: input, shape index: {}]   ;;  %s1788_s3 = inlined_call_operand.vmem [shape: f32[3,1], index: 3, kind: input, shape index: {}]   ;;  %s1789_s4 = inlined_call_operand.vmem [shape: f32[4,3,2048], index: 4, kind: output, shape index: {}]  }
   0x1   :  { %s1522_s17 = smov 0  }
   0x2 LB: > { %s26_s18 = sadd.s32 1, %s1486_s16  ;;  %p1064_p0 = scmp.ge.s32.totalorder %s1490_s17, 1  ;;  %s1490_s17 = sphi %s1522_s17, %s14_s17   ;;  %s1486_s16 = sphi %s1520_s16, %s1791_s16   ;;  %s1482_s15 = sphi %s1518_s15, %s1790_s15  }
   0x3   : > { %p28_p1 = scmp.ge.s32.totalorder %s26_s18, 4  ;;  %p192_p2 = scmp.lt.s32.totalorder %s1490_s17, 5 }
   0x5   : > { %s1793_s18 = smov (%p28_p1, %s26_s18), 0  ;;  %p193_p3 = pnand %p1064_p0, %p192_p2 }
   0x6   : > { %p230_p4 = scmp.lt.s32.totalorder (!%p193_p3), %s1482_s15, 3 }
   0x7   : > { %196 = sbr.rel (%p193_p3) target bundleno = 233 (0xe9), region = 36 }
   0xc   : > { %s1795_s15 = smov (!%p230_p4, %s1482_s15), 3  ;;  %v852_v0 = vld [vmem:[%s1787_s2] sm:$0x7]  ;;  %v1492_v1 = vmov 0   ;;  %vm640_vm0 = vcmask 523264   ;;  %vm936_vm1 = vcmask 1043456  }
   0xd   : > { %s1344_s21 = sshll.u32 %s1795_s15, 9  ;;  %1435 = vset.pattern.permute.xlu0 %v1492_v1  ;;  %s1065_s25 = sshll.u32 %s1795_s15, 1 }
   0xe   : > { %s1545_s24 = scalar_lea.vmem %s1786_s1, %s1344_s21  ;;  %855 = vperm.xlu0 %1435, %v852_v0   ;;  %s233_s28 = scalar_lea.vmem %s1785_s0, %s1065_s25 }
   0xf   : > { %v1264_v2 = vld [vmem:[%s1545_s24 + $0x180] sm:$0xf]  ;;  %v1394_v4 = vld [vmem:[%s1545_s24 + $0x184] sm:$0xf]  ;;  %v1272_v7 = vld [vmem:[%s1545_s24 + $0x188] sm:$0xf] }
  0x10   : > { %v1402_v3 = vld [vmem:[%s1545_s24 + $0x1bc] sm:$0xf0]  ;;  %v1266_v6 = vld [vmem:[%s1545_s24 + $0x1c0] sm:$0xf0]  ;;  %v1403_v8 = vld [vmem:[%s1545_s24 + $0x1c4] sm:$0xf0] }
  0x11   : > { %v1265_v5 = vor.u32 %v1402_v3, %v1264_v2  ;;  %v1269_v9 = vor.u32 %v1394_v4, %v1266_v6  ;;  %v1273_v10 = vor.u32 %v1403_v8, %v1272_v7  ;;  %v1395_v11 = vld [vmem:[%s1545_s24 + $0x18c] sm:$0xf]  ;;  %v1200_v13 = vld [vmem:[%s1545_s24 + $0x100] sm:$0xf]  ;;  %v1378_v16 = vld [vmem:[%s1545_s24 + $0x104] sm:$0xf] }
  0x12   : > { %v1274_v12 = vld [vmem:[%s1545_s24 + $0x1c8] sm:$0xf0]  ;;  %v1386_v15 = vld [vmem:[%s1545_s24 + $0x13c] sm:$0xf0]  ;;  %v1202_v17 = vld [vmem:[%s1545_s24 + $0x140] sm:$0xf0] }
  0x13   : > { %648 = vmatpush.bf16.msra.mxu0 %v1265_v5  ;;  %v1277_v14 = vor.u32 %v1395_v11, %v1274_v12  ;;  %661 = vmatpush.bf16.msra.mxu1 %v1269_v9  ;;  %v1201_v18 = vor.u32 %v1386_v15, %v1200_v13  ;;  %v1205_v19 = vor.u32 %v1378_v16, %v1202_v17  ;;  %v1208_v20 = vld [vmem:[%s1545_s24 + $0x108] sm:$0xf]  ;;  %v1379_v22 = vld [vmem:[%s1545_s24 + $0x10c] sm:$0xf]  ;;  %v1136_v25 = vld [vmem:[%s1545_s24 + $0x80] sm:$0xf] }
  0x14   : > { %674 = vmatpush.bf16.msra.mxu2 %v1273_v10  ;;  %v1387_v21 = vld [vmem:[%s1545_s24 + $0x144] sm:$0xf0]  ;;  %v1210_v24 = vld [vmem:[%s1545_s24 + $0x148] sm:$0xf0]  ;;  %v1370_v26 = vld [vmem:[%s1545_s24 + $0xbc] sm:$0xf0] }
  0x15   : > { %687 = vmatpush.bf16.msra.mxu3 %v1277_v14  ;;  %v1209_v23 = vor.u32 %v1387_v21, %v1208_v20  ;;  %v1213_v27 = vor.u32 %v1379_v22, %v1210_v24  ;;  %v1362_v28 = vld [vmem:[%s1545_s24 + $0x84] sm:$0xf]  ;;  %v1144_v30 = vld [vmem:[%s1545_s24 + $0x88] sm:$0xf]  ;;  %v1137_v31 = vor.u32 %v1370_v26, %v1136_v25  ;;  %v1363_v33 = vld [vmem:[%s1545_s24 + $0x8c] sm:$0xf] }
  0x16   : > { %v1138_v29 = vld [vmem:[%s1545_s24 + $0xc0] sm:$0xf0]  ;;  %v1371_v32 = vld [vmem:[%s1545_s24 + $0xc4] sm:$0xf0]  ;;  %v1146_v34 = vld [vmem:[%s1545_s24 + $0xc8] sm:$0xf0] }
  0x17   : > { %649 = vmatpush.bf16.msra.mxu0 %v1201_v18  ;;  %662 = vmatpush.bf16.msra.mxu1 %v1205_v19  ;;  %v1141_v35 = vor.u32 %v1362_v28, %v1138_v29  ;;  %v1145_v36 = vor.u32 %v1371_v32, %v1144_v30  ;;  %v1072_v37 = vld [vmem:[%s1545_s24] sm:$0xf]  ;;  %v1346_v39 = vld [vmem:[%s1545_s24 + $0x4] sm:$0xf]  ;;  %v1149_v40 = vor.u32 %v1363_v33, %v1146_v34  ;;  %v1080_v42 = vld [vmem:[%s1545_s24 + $0x8] sm:$0xf] }
  0x18   : > { %675 = vmatpush.bf16.msra.mxu2 %v1209_v23  ;;  %v1354_v38 = vld [vmem:[%s1545_s24 + $0x3c] sm:$0xf0]  ;;  %v1074_v41 = vld [vmem:[%s1545_s24 + $0x40] sm:$0xf0]  ;;  %v1355_v43 = vld [vmem:[%s1545_s24 + $0x44] sm:$0xf0] }
  0x19   : > { %688 = vmatpush.bf16.msra.mxu3 %v1213_v27  ;;  %v1347_v44 = vld [vmem:[%s1545_s24 + $0xc] sm:$0xf]  ;;  %v1073_v46 = vor.u32 %v1354_v38, %v1072_v37  ;;  %v1397_v47 = vld [vmem:[%s1545_s24 + $0x19c] sm:$0xf]  ;;  %v1280_v49 = vld [vmem:[%s1545_s24 + $0x190] sm:$0xf]  ;;  %v1077_v50 = vor.u32 %v1346_v39, %v1074_v41  ;;  %v1081_v51 = vor.u32 %v1355_v43, %v1080_v42 }
  0x1a   : > { %v1082_v45 = vld [vmem:[%s1545_s24 + $0x48] sm:$0xf0]  ;;  %v1290_v48 = vld [vmem:[%s1545_s24 + $0x1d8] sm:$0xf0]  ;;  %v1404_v52 = vld [vmem:[%s1545_s24 + $0x1cc] sm:$0xf0] }
  0x1b   : > { %650 = vmatpush.bf16.msra.mxu0 %v1137_v31  ;;  %663 = vmatpush.bf16.msra.mxu1 %v1141_v35  ;;  %v1085_v53 = vor.u32 %v1347_v44, %v1082_v45  ;;  %v1281_v54 = vor.u32 %v1404_v52, %v1280_v49  ;;  %v1396_v55 = vld [vmem:[%s1545_s24 + $0x194] sm:$0xf]  ;;  %v1288_v57 = vld [vmem:[%s1545_s24 + $0x198] sm:$0xf]  ;;  %v1293_v58 = vor.u32 %v1397_v47, %v1290_v48  ;;  %v1216_v60 = vld [vmem:[%s1545_s24 + $0x110] sm:$0xf] }
  0x1c   : > { %676 = vmatpush.bf16.msra.mxu2 %v1145_v36  ;;  %v1282_v56 = vld [vmem:[%s1545_s24 + $0x1d0] sm:$0xf0]  ;;  %v1405_v59 = vld [vmem:[%s1545_s24 + $0x1d4] sm:$0xf0]  ;;  %v1388_v61 = vld [vmem:[%s1545_s24 + $0x14c] sm:$0xf0] }
  0x1d   : > { %689 = vmatpush.bf16.msra.mxu3 %v1149_v40  ;;  %v1595_v62 = vld [vmem:[%s233_s28] sm:$0x3]  ;;  %v1381_v63 = vld [vmem:[%s1545_s24 + $0x11c] sm:$0xf]  ;;  %v1285_v1 = vor.u32 %v1396_v55, %v1282_v56  ;;  %v1289_v2 = vor.u32 %v1405_v59, %v1288_v57  ;;  %v1217_v3 = vor.u32 %v1388_v61, %v1216_v60  ;;  %v1380_v4 = vld [vmem:[%s1545_s24 + $0x114] sm:$0xf] }
  0x1e   : > { %v1226_v0 = vld [vmem:[%s1545_s24 + $0x158] sm:$0xf0]  ;;  %v1218_v5 = vld [vmem:[%s1545_s24 + $0x150] sm:$0xf0]  ;;  %v1224_v6 = vld [vmem:[%s1545_s24 + $0x118] sm:$0xf] }
  0x1f   : > { %651 = vmatpush.bf16.msra.mxu0 %v1073_v46  ;;  %664 = vmatpush.bf16.msra.mxu1 %v1077_v50  ;;  %v1229_v7 = vor.u32 %v1381_v63, %v1226_v0  ;;  %v1389_v8 = vld [vmem:[%s1545_s24 + $0x154] sm:$0xf0]  ;;  %v1152_v9 = vld [vmem:[%s1545_s24 + $0x90] sm:$0xf]  ;;  %v1365_v11 = vld [vmem:[%s1545_s24 + $0x9c] sm:$0xf]  ;;  %v1221_v13 = vor.u32 %v1380_v4, %v1218_v5 }
  0x20   : > { %677 = vmatpush.bf16.msra.mxu2 %v1081_v51  ;;  %v1372_v10 = vld [vmem:[%s1545_s24 + $0xcc] sm:$0xf0]  ;;  %v1162_v12 = vld [vmem:[%s1545_s24 + $0xd8] sm:$0xf0]  ;;  %v1364_v14 = vld [vmem:[%s1545_s24 + $0x94] sm:$0xf]  ;;  %v1225_v15 = vor.u32 %v1389_v8, %v1224_v6 }
  0x21   : > { %690 = vmatpush.bf16.msra.mxu3 %v1085_v53  ;;  %v1153_v16 = vor.u32 %v1372_v10, %v1152_v9  ;;  %v1154_v17 = vld [vmem:[%s1545_s24 + $0xd0] sm:$0xf0]  ;;  %v1160_v18 = vld [vmem:[%s1545_s24 + $0x98] sm:$0xf]  ;;  %v1165_v20 = vor.u32 %v1365_v11, %v1162_v12  ;;  %v1349_v21 = vld [vmem:[%s1545_s24 + $0x1c] sm:$0xf] }
  0x22   : > { %1326 = vmatmul.msk.bf16.vlgmr.msra.gmra.mxu0 %vm640_vm0, %v1595_v62  ;;  %1327 = vmatmul.msk.bf16.vlgmr.msra.gmra.mxu1 %vm640_vm0, %v1595_v62  ;;  %v1373_v19 = vld [vmem:[%s1545_s24 + $0xd4] sm:$0xf0]  ;;  %v1088_v22 = vld [vmem:[%s1545_s24 + $0x10] sm:$0xf]  ;;  %v1098_v24 = vld [vmem:[%s1545_s24 + $0x58] sm:$0xf0]  ;;  %v1157_v27 = vor.u32 %v1364_v14, %v1154_v17 }
  0x23   : > { %700 = vmatpush.bf16.msrb.mxu0 %v1281_v54  ;;  %1328 = vmatmul.msk.bf16.vlgmr.msra.gmra.mxu2 %vm640_vm0, %v1595_v62  ;;  %v1356_v23 = vld [vmem:[%s1545_s24 + $0x4c] sm:$0xf0]  ;;  %v1296_v25 = vld [vmem:[%s1545_s24 + $0x1a0] sm:$0xf]  ;;  %v1399_v28 = vld [vmem:[%s1545_s24 + $0x1ac] sm:$0xf]  ;;  %v1161_v31 = vor.u32 %v1373_v19, %v1160_v18  ;;  %v1101_v36 = vor.u32 %v1349_v21, %v1098_v24 }
  0x24   : > { %1329 = vmatmul.msk.bf16.vlgmr.msra.gmra.mxu3 %vm640_vm0, %v1595_v62  ;;  %713 = vmatpush.bf16.msrb.mxu1 %v1285_v1  ;;  %v1406_v26 = vld [vmem:[%s1545_s24 + $0x1dc] sm:$0xf0]  ;;  %v1306_v29 = vld [vmem:[%s1545_s24 + $0x1e8] sm:$0xf0]  ;;  %v1089_v32 = vor.u32 %v1356_v23, %v1088_v22  ;;  %v1348_v33 = vld [vmem:[%s1545_s24 + $0x14] sm:$0xf] }
  0x25   : > { %739 = vmatpush.bf16.msrb.mxu3 %v1293_v58  ;;  %726 = vmatpush.bf16.msrb.mxu2 %v1289_v2  ;;  %v874_v30 = vld [vmem:[%s1788_s3] sm:$0x7]  ;;  %v1090_v34 = vld [vmem:[%s1545_s24 + $0x50] sm:$0xf0]  ;;  %v1096_v35 = vld [vmem:[%s1545_s24 + $0x18] sm:$0xf]  ;;  %v1297_v38 = vor.u32 %v1406_v26, %v1296_v25  ;;  %v1309_v41 = vor.u32 %v1399_v28, %v1306_v29 }
  0x26   : > { %v1357_v37 = vld [vmem:[%s1545_s24 + $0x54] sm:$0xf0]  ;;  %v1398_v39 = vld [vmem:[%s1545_s24 + $0x1a4] sm:$0xf]  ;;  %877 = vperm.xlu0 %1435, %v874_v30   ;;  %v1304_v42 = vld [vmem:[%s1545_s24 + $0x1a8] sm:$0xf]  ;;  %v1093_v44 = vor.u32 %v1348_v33, %v1090_v34 }
  0x27   : > { %701 = vmatpush.bf16.msrb.mxu0 %v1217_v3  ;;  %v1298_v40 = vld [vmem:[%s1545_s24 + $0x1e0] sm:$0xf0]  ;;  %v1407_v43 = vld [vmem:[%s1545_s24 + $0x1e4] sm:$0xf0]  ;;  %v1383_v45 = vld [vmem:[%s1545_s24 + $0x12c] sm:$0xf]  ;;  %v1097_v47 = vor.u32 %v1357_v37, %v1096_v35 }
  0x28   : > { %714 = vmatpush.bf16.msrb.mxu1 %v1221_v13  ;;  %v1242_v46 = vld [vmem:[%s1545_s24 + $0x168] sm:$0xf0]  ;;  %v1301_v48 = vor.u32 %v1398_v39, %v1298_v40  ;;  %v1232_v49 = vld [vmem:[%s1545_s24 + $0x120] sm:$0xf]  ;;  %v1305_v50 = vor.u32 %v1407_v43, %v1304_v42  ;;  %v1382_v52 = vld [vmem:[%s1545_s24 + $0x124] sm:$0xf] }
  0x29   : > { %740 = vmatpush.bf16.msrb.mxu3 %v1229_v7  ;;  %727 = vmatpush.bf16.msrb.mxu2 %v1225_v15  ;;  %v1390_v51 = vld [vmem:[%s1545_s24 + $0x15c] sm:$0xf0]  ;;  %v1234_v53 = vld [vmem:[%s1545_s24 + $0x160] sm:$0xf0]  ;;  %v1245_v54 = vor.u32 %v1383_v45, %v1242_v46  ;;  %v1240_v55 = vld [vmem:[%s1545_s24 + $0x128] sm:$0xf] }
  0x2a   : > { %v1391_v56 = vld [vmem:[%s1545_s24 + $0x164] sm:$0xf0]  ;;  %v1367_v57 = vld [vmem:[%s1545_s24 + $0xac] sm:$0xf]  ;;  %v1233_v59 = vor.u32 %v1390_v51, %v1232_v49  ;;  %v1237_v60 = vor.u32 %v1382_v52, %v1234_v53  ;;  %v1168_v61 = vld [vmem:[%s1545_s24 + $0xa0] sm:$0xf] }
  0x2b   : > { %702 = vmatpush.bf16.msrb.mxu0 %v1153_v16  ;;  %v1178_v58 = vld [vmem:[%s1545_s24 + $0xe8] sm:$0xf0]  ;;  %v1241_v63 = vor.u32 %v1391_v56, %v1240_v55  ;;  %v1374_v0 = vld [vmem:[%s1545_s24 + $0xdc] sm:$0xf0]  ;;  %v1366_v1 = vld [vmem:[%s1545_s24 + $0xa4] sm:$0xf] }
  0x2c   : > { %715 = vmatpush.bf16.msrb.mxu1 %v1157_v27  ;;  %v1170_v2 = vld [vmem:[%s1545_s24 + $0xe0] sm:$0xf0]  ;;  %v1181_v3 = vor.u32 %v1367_v57, %v1178_v58  ;;  %v1176_v4 = vld [vmem:[%s1545_s24 + $0xa8] sm:$0xf]  ;;  %v1351_v6 = vld [vmem:[%s1545_s24 + $0x2c] sm:$0xf]  ;;  %v1169_v10 = vor.u32 %v1374_v0, %v1168_v61 }
  0x2d   : > { %741 = vmatpush.bf16.msrb.mxu3 %v1165_v20  ;;  %728 = vmatpush.bf16.msrb.mxu2 %v1161_v31  ;;  %v1375_v5 = vld [vmem:[%s1545_s24 + $0xe4] sm:$0xf0]  ;;  %v1114_v7 = vld [vmem:[%s1545_s24 + $0x68] sm:$0xf0]  ;;  %v1104_v8 = vld [vmem:[%s1545_s24 + $0x20] sm:$0xf]  ;;  %v1173_v11 = vor.u32 %v1366_v1, %v1170_v2 }
  0x2e   : > { %v1358_v9 = vld [vmem:[%s1545_s24 + $0x5c] sm:$0xf0]  ;;  %v1350_v12 = vld [vmem:[%s1545_s24 + $0x24] sm:$0xf]  ;;  %v1401_v13 = vld [vmem:[%s1545_s24 + $0x1bc] sm:$0xf]  ;;  %v1177_v15 = vor.u32 %v1375_v5, %v1176_v4  ;;  %v1117_v19 = vor.u32 %v1351_v6, %v1114_v7 }
  0x2f   : > { %703 = vmatpush.bf16.msrb.mxu0 %v1089_v32  ;;  %v1322_v14 = vld [vmem:[%s1545_s24 + $0x1f8] sm:$0xf0]  ;;  %v1106_v16 = vld [vmem:[%s1545_s24 + $0x60] sm:$0xf0]  ;;  %v1112_v17 = vld [vmem:[%s1545_s24 + $0x28] sm:$0xf]  ;;  %v1105_v27 = vor.u32 %v1358_v9, %v1104_v8 }
  0x30   : > { %716 = vmatpush.bf16.msrb.mxu1 %v1093_v44  ;;  %v1359_v18 = vld [vmem:[%s1545_s24 + $0x64] sm:$0xf0]  ;;  %v1312_v20 = vld [vmem:[%s1545_s24 + $0x1b0] sm:$0xf]  ;;  %v1400_v22 = vld [vmem:[%s1545_s24 + $0x1b4] sm:$0xf]  ;;  %v1325_v23 = vor.u32 %v1401_v13, %v1322_v14  ;;  %v1109_v28 = vor.u32 %v1350_v12, %v1106_v16 }
  0x31   : > { %742 = vmatpush.bf16.msrb.mxu3 %v1101_v36  ;;  %729 = vmatpush.bf16.msrb.mxu2 %v1097_v47  ;;  %v1408_v21 = vld [vmem:[%s1545_s24 + $0x1ec] sm:$0xf0]  ;;  %v1314_v24 = vld [vmem:[%s1545_s24 + $0x1f0] sm:$0xf0]  ;;  %v1320_v25 = vld [vmem:[%s1545_s24 + $0x1b8] sm:$0xf]  ;;  %v1113_v31 = vor.u32 %v1359_v18, %v1112_v17 }
  0x32   : > { %1330 = vmatmul.msk.bf16.vlgmr.msrb.gmra.mxu0 %vm640_vm0, %v1595_v62  ;;  %v1409_v26 = vld [vmem:[%s1545_s24 + $0x1f4] sm:$0xf0]  ;;  %v1385_v29 = vld [vmem:[%s1545_s24 + $0x13c] sm:$0xf]  ;;  %v1313_v32 = vor.u32 %v1408_v21, %v1312_v20  ;;  %v1317_v33 = vor.u32 %v1400_v22, %v1314_v24  ;;  %v1248_v36 = vld [vmem:[%s1545_s24 + $0x130] sm:$0xf] }
  0x33   : > { %752 = vmatpush.bf16.msra.mxu0 %v1297_v38  ;;  %1331 = vmatmul.msk.bf16.vlgmr.msrb.gmra.mxu1 %vm640_vm0, %v1595_v62  ;;  %v1258_v30 = vld [vmem:[%s1545_s24 + $0x178] sm:$0xf0]  ;;  %v1321_v34 = vor.u32 %v1409_v26, %v1320_v25  ;;  %v1392_v37 = vld [vmem:[%s1545_s24 + $0x16c] sm:$0xf0]  ;;  %v1384_v38 = vld [vmem:[%s1545_s24 + $0x134] sm:$0xf] }
  0x34   : > { %765 = vmatpush.bf16.msra.mxu1 %v1301_v48  ;;  %1332 = vmatmul.msk.bf16.vlgmr.msrb.gmra.mxu2 %vm640_vm0, %v1595_v62  ;;  %v1261_v35 = vor.u32 %v1385_v29, %v1258_v30  ;;  %v1250_v39 = vld [vmem:[%s1545_s24 + $0x170] sm:$0xf0]  ;;  %v1256_v40 = vld [vmem:[%s1545_s24 + $0x138] sm:$0xf]  ;;  %v1249_v42 = vor.u32 %v1392_v37, %v1248_v36  ;;  %v1369_v43 = vld [vmem:[%s1545_s24 + $0xbc] sm:$0xf] }
  0x35   : > { %791 = vmatpush.bf16.msra.mxu3 %v1309_v41  ;;  %778 = vmatpush.bf16.msra.mxu2 %v1305_v50  ;;  %v1393_v41 = vld [vmem:[%s1545_s24 + $0x174] sm:$0xf0]  ;;  %v1194_v44 = vld [vmem:[%s1545_s24 + $0xf8] sm:$0xf0]  ;;  %v1184_v45 = vld [vmem:[%s1545_s24 + $0xb0] sm:$0xf]  ;;  %v1253_v47 = vor.u32 %v1384_v38, %v1250_v39 }
  0x36   : > { %1333 = vmatmul.msk.bf16.vlgmr.msrb.gmra.mxu3 %vm640_vm0, %v1595_v62  ;;  %v1376_v46 = vld [vmem:[%s1545_s24 + $0xec] sm:$0xf0]  ;;  %v1257_v48 = vor.u32 %v1393_v41, %v1256_v40  ;;  %v1368_v49 = vld [vmem:[%s1545_s24 + $0xb4] sm:$0xf]  ;;  %v1197_v50 = vor.u32 %v1369_v43, %v1194_v44  ;;  %v1192_v52 = vld [vmem:[%s1545_s24 + $0xb8] sm:$0xf] }
  0x37   : > { %753 = vmatpush.bf16.msra.mxu0 %v1233_v59  ;;  %v1186_v51 = vld [vmem:[%s1545_s24 + $0xf0] sm:$0xf0]  ;;  %v1377_v53 = vld [vmem:[%s1545_s24 + $0xf4] sm:$0xf0]  ;;  %v1353_v55 = vld [vmem:[%s1545_s24 + $0x3c] sm:$0xf] }
  0x38   : > { %766 = vmatpush.bf16.msra.mxu1 %v1237_v60  ;;  %v1130_v56 = vld [vmem:[%s1545_s24 + $0x78] sm:$0xf0]  ;;  %v1120_v57 = vld [vmem:[%s1545_s24 + $0x30] sm:$0xf]  ;;  %v1189_v59 = vor.u32 %v1368_v49, %v1186_v51  ;;  %v1193_v60 = vor.u32 %v1377_v53, %v1192_v52  ;;  %v1352_v61 = vld [vmem:[%s1545_s24 + $0x34] sm:$0xf] }
  0x39   : > { %792 = vmatpush.bf16.msra.mxu3 %v1245_v54  ;;  %779 = vmatpush.bf16.msra.mxu2 %v1241_v63  ;;  %v1185_v54 = vor.u32 %v1376_v46, %v1184_v45  ;;  %v1360_v58 = vld [vmem:[%s1545_s24 + $0x6c] sm:$0xf0]  ;;  %v1133_v63 = vor.u32 %v1353_v55, %v1130_v56  ;;  %v1122_v0 = vld [vmem:[%s1545_s24 + $0x70] sm:$0xf0]  ;;  %v1128_v1 = vld [vmem:[%s1545_s24 + $0x38] sm:$0xf] }
  0x3a   : > { %v1361_v2 = vld [vmem:[%s1545_s24 + $0x74] sm:$0xf0]  ;;  %v1125_v4 = vor.u32 %v1352_v61, %v1122_v0  ;;  %s1345_s5 = sshll.u32 %s1795_s15, 6 }
  0x3b   : > { %754 = vmatpush.bf16.msra.mxu0 %v1169_v10  ;;  %v1129_v5 = vor.u32 %v1361_v2, %v1128_v1  ;;  %s1734_s8 = scalar_lea.vmem %s1789_s4, %s1345_s5 }
  0x3c   : > { %767 = vmatpush.bf16.msra.mxu1 %v1173_v11 }
  0x3d   : > { %793 = vmatpush.bf16.msra.mxu3 %v1181_v3  ;;  %780 = vmatpush.bf16.msra.mxu2 %v1177_v15  ;;  %v1121_v3 = vor.u32 %v1360_v58, %v1120_v57 }
  0x3f   : > { %755 = vmatpush.bf16.msra.mxu0 %v1105_v27 }
  0x40   : > { %768 = vmatpush.bf16.msra.mxu1 %v1109_v28 }
  0x41   : > { %794 = vmatpush.bf16.msra.mxu3 %v1117_v19  ;;  %781 = vmatpush.bf16.msra.mxu2 %v1113_v31 }
  0x42   : > { %1334 = vmatmul.msk.bf16.vlgmr.msra.gmra.mxu0 %vm640_vm0, %v1595_v62 }
  0x43   : > { %804 = vmatpush.bf16.msrb.mxu0 %v1313_v32  ;;  %1335 = vmatmul.msk.bf16.vlgmr.msra.gmra.mxu1 %vm640_vm0, %v1595_v62 }
  0x44   : > { %817 = vmatpush.bf16.msrb.mxu1 %v1317_v33  ;;  %1336 = vmatmul.msk.bf16.vlgmr.msra.gmra.mxu2 %vm640_vm0, %v1595_v62 }
  0x45   : > { %843 = vmatpush.bf16.msrb.mxu3 %v1325_v23  ;;  %830 = vmatpush.bf16.msrb.mxu2 %v1321_v34 }
  0x46   : > { %1337 = vmatmul.msk.bf16.vlgmr.msra.gmra.mxu3 %vm640_vm0, %v1595_v62 }
  0x47   : > { %805 = vmatpush.bf16.msrb.mxu0 %v1249_v42 }
  0x48   : > { %818 = vmatpush.bf16.msrb.mxu1 %v1253_v47 }
  0x49   : > { %844 = vmatpush.bf16.msrb.mxu3 %v1261_v35  ;;  %831 = vmatpush.bf16.msrb.mxu2 %v1257_v48 }
  0x4b   : > { %806 = vmatpush.bf16.msrb.mxu0 %v1185_v54 }
  0x4c   : > { %819 = vmatpush.bf16.msrb.mxu1 %v1189_v59 }
  0x4d   : > { %845 = vmatpush.bf16.msrb.mxu3 %v1197_v50  ;;  %832 = vmatpush.bf16.msrb.mxu2 %v1193_v60 }
  0x4f   : > { %807 = vmatpush.bf16.msrb.mxu0 %v1121_v3 }
  0x50   : > { %820 = vmatpush.bf16.msrb.mxu1 %v1125_v4 }
  0x51   : > { %846 = vmatpush.bf16.msrb.mxu3 %v1133_v63  ;;  %833 = vmatpush.bf16.msrb.mxu2 %v1129_v5 }
  0x52   : > { %1338 = vmatmul.msk.bf16.vlgmr.msrb.gmra.mxu0 %vm640_vm0, %v1595_v62 }
  0x53   : > { %1339 = vmatmul.msk.bf16.vlgmr.msrb.gmra.mxu1 %vm640_vm0, %v1595_v62 }
  0x54   : > { %1340 = vmatmul.msk.bf16.vlgmr.msrb.gmra.mxu2 %vm640_vm0, %v1595_v62 }
  0x56   : > { %1341 = vmatmul.msk.bf16.vlgmr.msrb.gmra.mxu3 %vm640_vm0, %v1595_v62 }
  0x80   : > { %v1718_v6 = vpop.permute.xlu0 %855 }
  0x98   : > { %v1721_v10 = vpop.permute.xlu0 %877 }
  0x9f   : > { %v653_v7 = vpop.f32.mrf.mxu0  ;;  %v666_v9 = vpop.f32.mrf.mxu1 }
  0xa0   : > { %v858_v8 = vmul.f32 %v1718_v6, %v653_v7  ;;  %v859_v11 = vmul.f32 %v1718_v6, %v666_v9 }
  0xa2   : > { %v880_v12 = vadd.f32 %v1721_v10, %v858_v8  ;;  %v881_v13 = vadd.f32 %v1721_v10, %v859_v11 }
  0xa4   : > { %1436 = vtanh.f32 %v880_v12 }
  0xa5   : > { %1438 = vtanh.f32 %v881_v13 }
  0xa6   : > { %v679_v14 = vpop.f32.mrf.mxu2 }
  0xa7   : > { %v860_v62 = vmul.f32 %v1718_v6, %v679_v14  ;;  %v692_v15 = vpop.f32.mrf.mxu3  ;;  %v655_v16 = vpop.f32.mrf.mxu0 }
  0xa8   : > { %v861_v17 = vmul.f32 %v1718_v6, %v692_v15  ;;  %v668_v18 = vpop.f32.mrf.mxu1 }
  0xa9   : > { %v882_v19 = vadd.f32 %v1721_v10, %v860_v62 }
  0xaa   : > { %v1437_v20 = vpop.eup %1436  ;;  %v883_v21 = vadd.f32 %v1721_v10, %v861_v17 }
  0xab   : > { %v1439_v22 = vpop.eup %1438  ;;  %1440 = vtanh.f32 %v882_v19 }
  0xac   : > { %1442 = vtanh.f32 %v883_v21  ;;  %v928_v23 = vrot.slane %v1439_v22, 4 }
  0xae   : > { %v681_v24 = vpop.f32.mrf.mxu2  ;;  %v937_v25 = vsel %vm936_vm1, %v1437_v20, %v928_v23 }
  0xaf   : > { %v694_v26 = vpop.f32.mrf.mxu3  ;;  %v705_v27 = vpop.f32.mrf.mxu0  ;;  %953 = vst [vmem:[%s1734_s8] sm:$0x77] %v937_v25 }
  0xb0   : > { %v862_v28 = vmul.f32 %v1718_v6, %v705_v27  ;;  %v718_v29 = vpop.f32.mrf.mxu1 }
  0xb1   : > { %v1441_v30 = vpop.eup %1440  ;;  %v863_v31 = vmul.f32 %v1718_v6, %v718_v29 }
  0xb2   : > { %v1443_v32 = vpop.eup %1442  ;;  %v884_v33 = vadd.f32 %v1721_v10, %v862_v28 }
  0xb3   : > { %v885_v34 = vadd.f32 %v1721_v10, %v863_v31  ;;  %v929_v35 = vrot.slane %v1443_v32, 4 }
  0xb4   : > { %1444 = vtanh.f32 %v884_v33 }
  0xb5   : > { %1446 = vtanh.f32 %v885_v34  ;;  %v938_v36 = vsel %vm936_vm1, %v1441_v30, %v929_v35 }
  0xb6   : > { %954 = vst [vmem:[%s1734_s8 + $0x8] sm:$0x77] %v938_v36 }
  0xb7   : > { %v731_v37 = vpop.f32.mrf.mxu2  ;;  %v707_v41 = vpop.f32.mrf.mxu0 }
  0xb8   : > { %v864_v39 = vmul.f32 %v1718_v6, %v731_v37  ;;  %v720_v42 = vpop.f32.mrf.mxu1 }
  0xb9   : > { %v744_v38 = vpop.f32.mrf.mxu3 }
  0xba   : > { %v865_v40 = vmul.f32 %v1718_v6, %v744_v38  ;;  %v1445_v43 = vpop.eup %1444  ;;  %v886_v44 = vadd.f32 %v1721_v10, %v864_v39 }
  0xbb   : > { %v1447_v46 = vpop.eup %1446 }
  0xbc   : > { %v887_v45 = vadd.f32 %v1721_v10, %v865_v40  ;;  %v930_v47 = vrot.slane %v1447_v46, 4  ;;  %1448 = vtanh.f32 %v886_v44 }
  0xbe   : > { %1450 = vtanh.f32 %v887_v45  ;;  %v939_v48 = vsel %vm936_vm1, %v1445_v43, %v930_v47 }
  0xbf   : > { %955 = vst [vmem:[%s1734_s8 + $0x10] sm:$0x77] %v939_v48  ;;  %v733_v49 = vpop.f32.mrf.mxu2  ;;  %v757_v51 = vpop.f32.mrf.mxu0 }
  0xc0   : > { %v770_v52 = vpop.f32.mrf.mxu1  ;;  %v866_v53 = vmul.f32 %v1718_v6, %v757_v51 }
  0xc1   : > { %v746_v50 = vpop.f32.mrf.mxu3  ;;  %v867_v54 = vmul.f32 %v1718_v6, %v770_v52 }
  0xc2   : > { %v1449_v55 = vpop.eup %1448  ;;  %v888_v57 = vadd.f32 %v1721_v10, %v866_v53 }
  0xc3   : > { %v889_v58 = vadd.f32 %v1721_v10, %v867_v54 }
  0xc4   : > { %v1451_v56 = vpop.eup %1450  ;;  %1452 = vtanh.f32 %v888_v57 }
  0xc5   : > { %v931_v59 = vrot.slane %v1451_v56, 4  ;;  %1454 = vtanh.f32 %v889_v58 }
  0xc7   : > { %v940_v60 = vsel %vm936_vm1, %v1449_v55, %v931_v59  ;;  %v783_v61 = vpop.f32.mrf.mxu2  ;;  %v759_v2 = vpop.f32.mrf.mxu0 }
  0xc8   : > { %956 = vst [vmem:[%s1734_s8 + $0x18] sm:$0x77] %v940_v60  ;;  %v868_v0 = vmul.f32 %v1718_v6, %v783_v61  ;;  %v772_v3 = vpop.f32.mrf.mxu1 }
  0xc9   : > { %v796_v63 = vpop.f32.mrf.mxu3 }
  0xca   : > { %v869_v1 = vmul.f32 %v1718_v6, %v796_v63  ;;  %v890_v4 = vadd.f32 %v1721_v10, %v868_v0  ;;  %v1453_v7 = vpop.eup %1452 }
  0xcb   : > { %v1455_v8 = vpop.eup %1454 }
  0xcc   : > { %v891_v5 = vadd.f32 %v1721_v10, %v869_v1  ;;  %1456 = vtanh.f32 %v890_v4  ;;  %v932_v9 = vrot.slane %v1455_v8, 4 }
  0xce   : > { %1458 = vtanh.f32 %v891_v5  ;;  %v941_v11 = vsel %vm936_vm1, %v1453_v7, %v932_v9 }
  0xcf   : > { %v785_v12 = vpop.f32.mrf.mxu2  ;;  %957 = vst [vmem:[%s1734_s8 + $0x20] sm:$0x77] %v941_v11  ;;  %v809_v14 = vpop.f32.mrf.mxu0 }
  0xd0   : > { %v822_v62 = vpop.f32.mrf.mxu1  ;;  %v870_v15 = vmul.f32 %v1718_v6, %v809_v14 }
  0xd1   : > { %v798_v13 = vpop.f32.mrf.mxu3  ;;  %v871_v16 = vmul.f32 %v1718_v6, %v822_v62 }
  0xd2   : > { %v1457_v17 = vpop.eup %1456  ;;  %v892_v21 = vadd.f32 %v1721_v10, %v870_v15 }
  0xd3   : > { %v893_v19 = vadd.f32 %v1721_v10, %v871_v16 }
  0xd4   : > { %v1459_v18 = vpop.eup %1458 }
  0xd5   : > { %v933_v20 = vrot.slane %v1459_v18, 4  ;;  %1460 = vtanh.f32 %v893_v19 }
  0xd6   : > { %1462 = vtanh.f32 %v892_v21 }
  0xd7   : > { %v942_v22 = vsel %vm936_vm1, %v1457_v17, %v933_v20  ;;  %v835_v23 = vpop.f32.mrf.mxu2  ;;  %v811_v27 = vpop.f32.mrf.mxu0 }
  0xd8   : > { %958 = vst [vmem:[%s1734_s8 + $0x28] sm:$0x77] %v942_v22  ;;  %v872_v25 = vmul.f32 %v1718_v6, %v835_v23  ;;  %v824_v28 = vpop.f32.mrf.mxu1 }
  0xd9   : > { %v848_v24 = vpop.f32.mrf.mxu3 }
  0xda   : > { %v873_v26 = vmul.f32 %v1718_v6, %v848_v24  ;;  %v894_v30 = vadd.f32 %v1721_v10, %v872_v25 }
  0xdb   : > { %v1461_v31 = vpop.eup %1460 }
  0xdc   : > { %v895_v29 = vadd.f32 %v1721_v10, %v873_v26  ;;  %v934_v32 = vrot.slane %v1461_v31, 4  ;;  %v1463_v33 = vpop.eup %1462 }
  0xde   : > { %1464 = vtanh.f32 %v895_v29  ;;  %v943_v34 = vsel %vm936_vm1, %v1463_v33, %v934_v32 }
  0xdf   : > { %1466 = vtanh.f32 %v894_v30  ;;  %v837_v35 = vpop.f32.mrf.mxu2  ;;  %959 = vst [vmem:[%s1734_s8 + $0x30] sm:$0x77] %v943_v34 }
  0xe1   : > { %v850_v36 = vpop.f32.mrf.mxu3 }
  0xe4   : > { %v1465_v37 = vpop.eup %1464 }
  0xe5   : > { %v935_v38 = vrot.slane %v1465_v37, 4  ;;  %v1467_v6 = vpop.eup %1466 }
  0xe7   : > { %v944_v39 = vsel %vm936_vm1, %v1467_v6, %v935_v38 }
  0xe8   : > { %960 = vst [vmem:[%s1734_s8 + $0x38] sm:$0x77] %v944_v39 }
  0xe9 PF: > { %s14_s17 = sadd.s32 1, %s1490_s17   ;;  %s1790_s15 = smov %s1486_s16 }
  0xea   : > { %p11_p5 = scmp.ge.s32.totalorder %s14_s17, 6   ;;  %s1791_s16 = smov %s1793_s18 }
  0xec   :  { %13 = sbr.rel (!%p11_p5) target bundleno = 2 (0x2), region = 69 }

</bundles_post_ra>
